<compile_context>
chip_gen: v7x
topology: tpu7x:2x2x1
jax: 0.10.0
libtpu: 0.0.40
codegen_flags: <defaults>
</compile_context>

<pallas_src>
import jax
import jax.numpy as jnp
import numpy as np
from jax.experimental import pallas as pl
from jax.experimental.pallas import tpu as pltpu

RAY_DIM = 7
H = 50                      # ray_hidden_dim (module default)
H_PAD = 64                  # padded feature length: [features(50), 1.0, zeros]
IN_DIM = 21
DIMS = (256, 256, 256, 7)
TN = 8192                   # column tile for the fused head GEMV

# static segment bookkeeping
TOTAL = 0
_prvs = IN_DIM
for _d in DIMS:
    TOTAL += _prvs * _d + _d
    _prvs = _d
NUM_TILES = (TOTAL + TN - 1) // TN
TOTAL_PAD = NUM_TILES * TN


# ---------------------------------------------------------------------------
# Kernel: ray MLP (recomputed per tile) + one column-tile of the fused GEMV
# ---------------------------------------------------------------------------
def hyper_head_kernel(ray_ref, w0_ref, b0_ref, w1_ref, b1_ref, w2_ref, b2_ref,
                      wpk_ref, o_ref):
    # tiny 7->50->50->H_PAD ray MLP; ~10 kFLOP, hidden under the weight DMA
    h = jnp.dot(ray_ref[...], w0_ref[...],
                preferred_element_type=jnp.float32) + b0_ref[...]
    h = jnp.maximum(h, 0.0)
    h = jnp.dot(h, w1_ref[...], preferred_element_type=jnp.float32) + b1_ref[...]
    h = jnp.maximum(h, 0.0)
    feat = (jnp.dot(h, w2_ref[...], preferred_element_type=jnp.float32)
            + b2_ref[...])                     # (1, H_PAD); feat[0, H] == 1.0
    # fused-head GEMV for this column tile: bf16 weights, f32 accumulate
    o_ref[...] = jnp.dot(feat.astype(jnp.bfloat16), wpk_ref[...],
                         preferred_element_type=jnp.float32)


# ---------------------------------------------------------------------------
# Parameter construction (deterministic, PyTorch-Linear-like uniform init)
# Weights stored as (in_features, out_features): every layer is x @ W + b.
# ---------------------------------------------------------------------------
def _linear_params(key, fan_in, fan_out):
    k_w, k_b = jax.random.split(key)
    bound = 1.0 / np.sqrt(fan_in)
    w = jax.random.uniform(k_w, (fan_in, fan_out), jnp.float32, -bound, bound)
    b = jax.random.uniform(k_b, (fan_out,), jnp.float32, -bound, bound)
    return w, b


def init_params(seed=0):
    key = jax.random.PRNGKey(seed)
    keys = jax.random.split(key, 3 + 2 * len(DIMS))
    p = {}
    p["ray0"] = _linear_params(keys[0], RAY_DIM, H)
    p["ray1"] = _linear_params(keys[1], H, H)
    p["ray2"] = _linear_params(keys[2], H, H)
    prvs = IN_DIM
    ki = 3
    for i, dim in enumerate(DIMS):
        p[f"fc_{i}_weights"] = _linear_params(keys[ki], H, prvs * dim); ki += 1
        p[f"fc_{i}_bias"] = _linear_params(keys[ki], H, dim); ki += 1
        prvs = dim
    return p


def build_packed(params):
    """Fuse all hyper-head Linears: bias-as-row, bf16, tile-contiguous layout."""
    w_cols, b_cols = [], []
    prvs = IN_DIM
    for i, dim in enumerate(DIMS):
        for name in (f"fc_{i}_weights", f"fc_{i}_bias"):
            w, b = params[name]
            w_cols.append(w)
            b_cols.append(b)
        prvs = dim
    w_all = jnp.concatenate(w_cols, axis=1)              # (H, TOTAL)
    b_all = jnp.concatenate(b_cols, axis=0)[None, :]      # (1, TOTAL)
    wb = jnp.concatenate([w_all, b_all], axis=0)           # (H+1, TOTAL)
    wb = jnp.pad(wb, ((0, H_PAD - (H + 1)), (0, TOTAL_PAD - TOTAL)))
    # tile-contiguous: tile j holds columns [j*TN, (j+1)*TN) as one dense block
    w_packed = (wb.reshape(H_PAD, NUM_TILES, TN)
                  .transpose(1, 0, 2)
                  .astype(jnp.bfloat16))                   # (NUM_TILES, H_PAD, TN)

    # pad the last ray-MLP layer so the feature vector is (1, H_PAD) with an
    # explicit 1.0 in slot H (selects the bias row of w_packed), zeros after.
    w2, b2 = params["ray2"]
    w2p = jnp.pad(w2, ((0, 0), (0, H_PAD - H)))            # (H, H_PAD)
    b2p = jnp.concatenate([b2, jnp.ones((1,), jnp.float32),
                           jnp.zeros((H_PAD - H - 1,), jnp.float32)])[None, :]
    return w_packed, w2p, b2p


# ---------------------------------------------------------------------------
# Forward
# ---------------------------------------------------------------------------
@jax.jit
def hyper_mlp_forward(ray, w0, b0, w1, b1, w2p, b2p, w_packed):
    ray2 = ray.reshape(1, RAY_DIM)

    def full(shape):
        n = len(shape)
        return pl.BlockSpec(shape, lambda j: (0,) * n)

    out = pl.pallas_call(
        hyper_head_kernel,
        out_shape=jax.ShapeDtypeStruct((1, TOTAL_PAD), jnp.float32),
        grid=(NUM_TILES,),
        in_specs=[
            full((1, RAY_DIM)),
            full((RAY_DIM, H)), full((1, H)),
            full((H, H)), full((1, H)),
            full((H, H_PAD)), full((1, H_PAD)),
            pl.BlockSpec((None, H_PAD, TN), lambda j: (j, 0, 0)),
        ],
        out_specs=pl.BlockSpec((1, TN), lambda j: (0, j)),
        compiler_params=pltpu.CompilerParams(
            dimension_semantics=("parallel",)),
        cost_estimate=pl.CostEstimate(
            flops=2 * H_PAD * TOTAL_PAD,
            transcendentals=0,
            bytes_accessed=H_PAD * TOTAL_PAD * 2 + TOTAL_PAD * 4),
    )(ray2, w0, b0.reshape(1, H), w1, b1.reshape(1, H), w2p, b2p, w_packed)

    flat = out[0, :TOTAL]
    out_dict = {}
    off = 0
    prvs = IN_DIM
    for i, dim in enumerate(DIMS):
        n_w = prvs * dim
        out_dict[f"fc_{i}_weights"] = flat[off:off + n_w].reshape(dim, prvs)
        off += n_w
        out_dict[f"fc_{i}_bias"] = flat[off:off + dim]
        off += dim
        prvs = dim
    return out_dict


# ---------------------------------------------------------------------------
# Pure-JAX f32 reference (semantics of the PyTorch module)
# ---------------------------------------------------------------------------
def reference_forward(ray, params):
    (w0, b0), (w1, b1), (w2, b2) = params["ray0"], params["ray1"], params["ray2"]
    f = jnp.maximum(ray @ w0 + b0, 0.0)
    f = jnp.maximum(f @ w1 + b1, 0.0)
    f = f @ w2 + b2
    out = {}
    prvs = IN_DIM
    for i, dim in enumerate(DIMS):
        w, b = params[f"fc_{i}_weights"]
        out[f"fc_{i}_weights"] = (f @ w + b).reshape(dim, prvs)
        w, b = params[f"fc_{i}_bias"]
        out[f"fc_{i}_bias"] = (f @ w + b).reshape(-1)
        prvs = dim
    return out


# ---------------------------------------------------------------------------
if __name__ == "__main__":
    params = init_params(seed=0)
    w_packed, w2p, b2p = build_packed(params)
    (w0, b0), (w1, b1) = params["ray0"], params["ray1"]

    # deterministic example input: a 7-dim preference "ray"
    ray = jax.random.uniform(jax.random.PRNGKey(0), (RAY_DIM,), jnp.float32)

    out_dict = hyper_mlp_forward(ray, w0, b0, w1, b1, w2p, b2p, w_packed)
    jax.block_until_ready(out_dict)

    ref = reference_forward(ray, params)
    for k in ref:
        assert out_dict[k].shape == ref[k].shape, (k, out_dict[k].shape, ref[k].shape)
        # tolerance loosened vs f32 reference because head weights are bf16
        np.testing.assert_allclose(np.asarray(out_dict[k]), np.asarray(ref[k]),
                                   rtol=5e-2, atol=1e-2)

    print("KERNEL_OK")
</pallas_src>

<mosaic_0001>
module attributes {stable_mosaic.version = 11 : i64} {
  func.func @hyper_head_kernel(%arg0: i32, %arg1: memref<1x7xf32, #tpu.memory_space<vmem>>, %arg2: memref<7x50xf32, #tpu.memory_space<vmem>>, %arg3: memref<1x50xf32, #tpu.memory_space<vmem>>, %arg4: memref<50x50xf32, #tpu.memory_space<vmem>>, %arg5: memref<1x50xf32, #tpu.memory_space<vmem>>, %arg6: memref<50x64xf32, #tpu.memory_space<vmem>>, %arg7: memref<1x64xf32, #tpu.memory_space<vmem>>, %arg8: memref<1x64x8192xbf16, #tpu.memory_space<vmem>>, %arg9: memref<1x8192xf32, #tpu.memory_space<vmem>>) attributes {dimension_semantics = [#tpu.dimension_semantics<parallel>], iteration_bounds = array<i64: 17>, scalar_prefetch = 0 : i64, scratch_operands = 0 : i64, tpu.core_type = #tpu.core_type<tc>, window_params = [{pipeline_mode = #tpu.pipeline_mode<synchronous>, transform_indices = @transform_0, window_bounds = array<i64: 1, 7>}, {pipeline_mode = #tpu.pipeline_mode<synchronous>, transform_indices = @transform_1, window_bounds = array<i64: 7, 50>}, {pipeline_mode = #tpu.pipeline_mode<synchronous>, transform_indices = @transform_2, window_bounds = array<i64: 1, 50>}, {pipeline_mode = #tpu.pipeline_mode<synchronous>, transform_indices = @transform_3, window_bounds = array<i64: 50, 50>}, {pipeline_mode = #tpu.pipeline_mode<synchronous>, transform_indices = @transform_4, window_bounds = array<i64: 1, 50>}, {pipeline_mode = #tpu.pipeline_mode<synchronous>, transform_indices = @transform_5, window_bounds = array<i64: 50, 64>}, {pipeline_mode = #tpu.pipeline_mode<synchronous>, transform_indices = @transform_6, window_bounds = array<i64: 1, 64>}, {transform_indices = @transform_7, window_bounds = array<i64: 1, 64, 8192>}, {transform_indices = @transform_8, window_bounds = array<i64: 1, 8192>}]} {
    %c0 = arith.constant 0 : index
    %c0_0 = arith.constant 0 : index
    %0 = vector.load %arg1[%c0, %c0_0] : memref<1x7xf32, #tpu.memory_space<vmem>>, vector<1x7xf32>
    %c0_1 = arith.constant 0 : index
    %c0_2 = arith.constant 0 : index
    %1 = vector.load %arg2[%c0_1, %c0_2] : memref<7x50xf32, #tpu.memory_space<vmem>>, vector<7x50xf32>
    %cst = arith.constant dense<0.000000e+00> : vector<1x50xf32>
    %2 = tpu.matmul %0, %1, %cst {dimension_numbers = #tpu.dot_dimension_numbers<[1], [0], [0], [1], [0, 0, 1, 1], [], []>} : vector<1x7xf32>, vector<7x50xf32>, vector<1x50xf32> -> vector<1x50xf32>
    %c0_3 = arith.constant 0 : index
    %c0_4 = arith.constant 0 : index
    %3 = vector.load %arg3[%c0_3, %c0_4] : memref<1x50xf32, #tpu.memory_space<vmem>>, vector<1x50xf32>
    %4 = arith.addf %2, %3 : vector<1x50xf32>
    %cst_5 = arith.constant 0.000000e+00 : f32
    %5 = vector.broadcast %cst_5 : f32 to vector<1x50xf32>
    %6 = arith.maximumf %4, %5 : vector<1x50xf32>
    %c0_6 = arith.constant 0 : index
    %c0_7 = arith.constant 0 : index
    %7 = vector.load %arg4[%c0_6, %c0_7] : memref<50x50xf32, #tpu.memory_space<vmem>>, vector<50x50xf32>
    %cst_8 = arith.constant dense<0.000000e+00> : vector<1x50xf32>
    %8 = tpu.matmul %6, %7, %cst_8 {dimension_numbers = #tpu.dot_dimension_numbers<[1], [0], [0], [1], [0, 0, 1, 1], [], []>} : vector<1x50xf32>, vector<50x50xf32>, vector<1x50xf32> -> vector<1x50xf32>
    %c0_9 = arith.constant 0 : index
    %c0_10 = arith.constant 0 : index
    %9 = vector.load %arg5[%c0_9, %c0_10] : memref<1x50xf32, #tpu.memory_space<vmem>>, vector<1x50xf32>
    %10 = arith.addf %8, %9 : vector<1x50xf32>
    %cst_11 = arith.constant 0.000000e+00 : f32
    %11 = vector.broadcast %cst_11 : f32 to vector<1x50xf32>
    %12 = arith.maximumf %10, %11 : vector<1x50xf32>
    %c0_12 = arith.constant 0 : index
    %c0_13 = arith.constant 0 : index
    %13 = vector.load %arg6[%c0_12, %c0_13] : memref<50x64xf32, #tpu.memory_space<vmem>>, vector<50x64xf32>
    %cst_14 = arith.constant dense<0.000000e+00> : vector<1x64xf32>
    %14 = tpu.matmul %12, %13, %cst_14 {dimension_numbers = #tpu.dot_dimension_numbers<[1], [0], [0], [1], [0, 0, 1, 1], [], []>} : vector<1x50xf32>, vector<50x64xf32>, vector<1x64xf32> -> vector<1x64xf32>
    %c0_15 = arith.constant 0 : index
    %c0_16 = arith.constant 0 : index
    %15 = vector.load %arg7[%c0_15, %c0_16] : memref<1x64xf32, #tpu.memory_space<vmem>>, vector<1x64xf32>
    %16 = arith.addf %14, %15 : vector<1x64xf32>
    %17 = arith.truncf %16 : vector<1x64xf32> to vector<1x64xbf16>
    %c0_17 = arith.constant 0 : index
    %c0_18 = arith.constant 0 : index
    %c0_19 = arith.constant 0 : index
    %18 = vector.load %arg8[%c0_17, %c0_18, %c0_19] : memref<1x64x8192xbf16, #tpu.memory_space<vmem>>, vector<1x64x8192xbf16>
    %19 = vector.shape_cast %18 : vector<1x64x8192xbf16> to vector<64x8192xbf16>
    %cst_20 = arith.constant dense<0.000000e+00> : vector<1x8192xf32>
    %20 = tpu.matmul %17, %19, %cst_20 {dimension_numbers = #tpu.dot_dimension_numbers<[1], [0], [0], [1], [0, 0, 1, 1], [], []>} : vector<1x64xbf16>, vector<64x8192xbf16>, vector<1x8192xf32> -> vector<1x8192xf32>
    %c0_21 = arith.constant 0 : index
    %c0_22 = arith.constant 0 : index
    %21 = vector.load %arg9[%c0_21, %c0_22] : memref<1x8192xf32, #tpu.memory_space<vmem>>, vector<1x8192xf32>
    tpu.vector_store %arg9[%c0_21, %c0_22], %20 {strides = array<i32>} : memref<1x8192xf32, #tpu.memory_space<vmem>>, vector<1x8192xf32>,
    return
  }
  func.func @transform_0(%arg0: i32) -> (i32, i32) {
    %c0_i32 = arith.constant 0 : i32
    %c0_i32_0 = arith.constant 0 : i32
    %c0_i32_1 = arith.constant 0 : i32
    return %c0_i32, %c0_i32_0 : i32, i32
  }
  func.func @transform_1(%arg0: i32) -> (i32, i32) {
    %c0_i32 = arith.constant 0 : i32
    %c0_i32_0 = arith.constant 0 : i32
    %c0_i32_1 = arith.constant 0 : i32
    return %c0_i32, %c0_i32_0 : i32, i32
  }
  func.func @transform_2(%arg0: i32) -> (i32, i32) {
    %c0_i32 = arith.constant 0 : i32
    %c0_i32_0 = arith.constant 0 : i32
    %c0_i32_1 = arith.constant 0 : i32
    return %c0_i32, %c0_i32_0 : i32, i32
  }
  func.func @transform_3(%arg0: i32) -> (i32, i32) {
    %c0_i32 = arith.constant 0 : i32
    %c0_i32_0 = arith.constant 0 : i32
    %c0_i32_1 = arith.constant 0 : i32
    return %c0_i32, %c0_i32_0 : i32, i32
  }
  func.func @transform_4(%arg0: i32) -> (i32, i32) {
    %c0_i32 = arith.constant 0 : i32
    %c0_i32_0 = arith.constant 0 : i32
    %c0_i32_1 = arith.constant 0 : i32
    return %c0_i32, %c0_i32_0 : i32, i32
  }
  func.func @transform_5(%arg0: i32) -> (i32, i32) {
    %c0_i32 = arith.constant 0 : i32
    %c0_i32_0 = arith.constant 0 : i32
    %c0_i32_1 = arith.constant 0 : i32
    return %c0_i32, %c0_i32_0 : i32, i32
  }
  func.func @transform_6(%arg0: i32) -> (i32, i32) {
    %c0_i32 = arith.constant 0 : i32
    %c0_i32_0 = arith.constant 0 : i32
    %c0_i32_1 = arith.constant 0 : i32
    return %c0_i32, %c0_i32_0 : i32, i32
  }
  func.func @transform_7(%arg0: i32) -> (i32, i32, i32) {
    %c0_i32 = arith.constant 0 : i32
    %c0_i32_0 = arith.constant 0 : i32
    %c0_i32_1 = arith.constant 0 : i32
    return %arg0, %c0_i32, %c0_i32_0 : i32, i32, i32
  }
  func.func @transform_8(%arg0: i32) -> (i32, i32) {
    %c0_i32 = arith.constant 0 : i32
    %c0_i32_0 = arith.constant 0 : i32
    return %c0_i32, %arg0 : i32, i32
  }
}

</mosaic_0001>

<bundles_post_ra>
// kernel: hyper_mlp_forward.1
= control target key start
LH: loop header
LB: loop body
LE: loop exit
PB: predicated region body
PF: predicated region fallthrough
CT: control target
= control target key end

     0   :  { %s5709_s0 = inlined_call_operand.hbm [shape: f32[1,7], index: 0, kind: input, shape index: {}]   ;;  %s5710_s1 = inlined_call_operand.hbm [shape: f32[7,50], index: 1, kind: input, shape index: {}]   ;;  %s5711_s2 = inlined_call_operand.hbm [shape: f32[1,50], index: 2, kind: input, shape index: {}]   ;;  %s5712_s3 = inlined_call_operand.hbm [shape: f32[50,50], index: 3, kind: input, shape index: {}]   ;;  %s5713_s4 = inlined_call_operand.hbm [shape: f32[1,50], index: 4, kind: input, shape index: {}]   ;;  %s5714_s5 = inlined_call_operand.hbm [shape: f32[50,64], index: 5, kind: input, shape index: {}]   ;;  %s5715_s6 = inlined_call_operand.hbm [shape: f32[1,64], index: 6, kind: input, shape index: {}]   ;;  %s5716_s7 = inlined_call_operand.hbm [shape: bf16[17,64,8192], index: 7, kind: input, shape index: {}]   ;;  %s5717_s8 = inlined_call_operand.vmem [shape: f32[1,139264], index: 8, kind: output, shape index: {}]  }
   0x1   :  { %5722 = sst [smem:[#allocation20_spill]] %s5710_s1 }
   0x2   :  { %13 = vsyncpa [#allocation3], 0 }
   0x3   :  { %14 = vsyncpa [#allocation5], 0 }
   0x4   :  { %15 = vsyncpa [#allocation8], 0 }
   0x5   :  { %16 = vsyncpa [#allocation11], 0 }
   0x6   :  { %17 = vsyncpa [#allocation14], 0 }
   0x7   :  { %19 = vsyncpa [#allocation14 + $0x1], 0  ;;  %s4981_s27 = smov 0   ;;  %s4983_s28 = smov 0  }
   0x8   :  { %s4985_s29 = smov 0   ;;  %s4987_s30 = smov 0  }
   0x9 LB: > { %s4919_s9 = smov [#allocation4]   ;;  %s5721_s11 = sadd.s32 4294967295, %s4917_s30   ;;  %s4917_s30 = sphi %s4987_s30, %s5737_s30   ;;  %s4913_s29 = sphi %s4985_s29, %s5736_s29   ;;  %s4909_s28 = sphi %s4983_s28, %s5735_s28   ;;  %s4905_s27 = sphi %s4981_s27, %s5734_s27  }
   0xa   : > { %s253_s10 = sshll.u32 %s4919_s9, 4  ;;  %p4128_p0 = scmp.ge.s32.totalorder %s4917_s30, 1  ;;  %s254_s10 = int_to_ptr.vmem [resolvable:$true] %s253_s10 }
   0xb   : > { %p5005_p1 = scmp.eq.s32.totalorder %s5721_s11, 0  ;;  %p229_p2 = scmp.lt.s32.totalorder %s4917_s30, 18 }
   0xc   : > { %s4920_s14 = smov [#allocation7]   ;;  %s4921_s17 = smov [#allocation10]  }
   0xd   : > { %s5723_s12 = scalar_select %p5005_p1, 1, 0 }
   0xe   : > { %p5010_p3 = pnand %p4128_p0, %p229_p2  ;;  %s274_s15 = sshll.u32 %s4920_s14, 4  ;;  %s5016_s15 = int_to_ptr.vmem [resolvable:$true] %s274_s15 }
   0xf   : > { %s298_s18 = sshll.u32 %s4921_s17, 4  ;;  %s5726_s1 = sld [smem:[#allocation20_spill]]  ;;  %s5024_s18 = int_to_ptr.vmem [resolvable:$true] %s298_s18 }
  0x10   : > { %s5724_s13 = scalar_select %p5010_p3, 1, 0 }
  0x11   : > { %p4552_p4 = pneg %p5010_p3 }
  0x13   : > { %p5020_p5 = pnand %p4552_p4, %p5005_p1 }
  0x15   : > { %s4641_s21 = scalar_lea.hbm %s5726_s1, 128  ;;  %p5034_p7 = pneg %p5020_p5 }
  0x16   : > { %p4642_p6 = scmp.ne.s32.totalorder %s5726_s1, %s4641_s21  ;;  %p4648_p10 = scmp.lt.u32.totalorder %s4641_s21, %s5726_s1 }
  0x18   : > { %p4644_p8 = pnand %p5034_p7, %p4642_p6 }
  0x1a   : > { %p4645_p9 = pneg %p4644_p8 }
  0x1c   : > { %p4650_p11 = pnand %p4648_p10, %p4645_p9 }
  0x1e   : > { %4653 = shalt.err (!%p4650_p11)
}
  0x1f   : > { %s4654_s9 = scalar_lea.vmem %s254_s10, 128  ;;  %p4662_p2 = scmp.lt.s32.totalorder %s254_s10, %s254_s10 }
  0x20   : > { %p4655_p12 = scmp.ne.s32.totalorder %s254_s10, %s4654_s9  ;;  %p4663_p4 = scmp.lt.s32.totalorder %s4654_s9, %s4654_s9 }
  0x22   : > { %p4657_p13 = pnand %p4655_p12, %p5034_p7  ;;  %p4664_p3 = por %p4663_p4, %p4662_p2 }
  0x24   : > { %p4658_p0 = pneg %p4657_p13 }
  0x26   : > { %p4665_p1 = pnand %p4664_p3, %p4658_p0 }
  0x28   : > { %4668 = shalt.err (!%p4665_p1)
}
  0x29   : > { %4558 = dma.hbm_to_vmem [thread:$0]  (!%p5020_p5), %s5726_s1, 128, %s254_s10, [#allocation5]  }
  0x2a   : > { %s4669_s21 = scalar_lea.hbm %s5712_s3, 896 }
  0x2b   : > { %p4670_p6 = scmp.ne.s32.totalorder %s5712_s3, %s4669_s21  ;;  %p4676_p1 = scmp.lt.u32.totalorder %s4669_s21, %s5712_s3 }
  0x2d   : > { %p4672_p8 = pnand %p4670_p6, %p5034_p7 }
  0x2f   : > { %p4673_p9 = pneg %p4672_p8 }
  0x31   : > { %p4678_p3 = pnand %p4676_p1, %p4673_p9 }
  0x33   : > { %4681 = shalt.err (!%p4678_p3)
}
  0x34   : > { %s4682_s10 = scalar_lea.vmem %s5016_s15, 896  ;;  %p4690_p13 = scmp.lt.s32.totalorder %s5016_s15, %s5016_s15 }
  0x35   : > { %p4683_p10 = scmp.ne.s32.totalorder %s5016_s15, %s4682_s10  ;;  %p4691_p0 = scmp.lt.s32.totalorder %s4682_s10, %s4682_s10 }
  0x37   : > { %p4685_p11 = pnand %p4683_p10, %p5034_p7  ;;  %p4692_p2 = por %p4691_p0, %p4690_p13 }
  0x39   : > { %p4686_p12 = pneg %p4685_p11 }
  0x3b   : > { %p4693_p4 = pnand %p4692_p2, %p4686_p12 }
  0x3d   : > { %4696 = shalt.err (!%p4693_p4)
}
  0x3e   : > { %s4922_s9 = smov 128   ;;  %s4923_s14 = smov 8  }
  0x3f   : > { %4564 = dma.hbm_to_vmem [thread:$0]  (!%p5020_p5), %s5712_s3, 896, %s5016_s15, [#allocation8], %s4922_s9, %s4922_s9, %s4923_s14  }
  0x40   : > { %s4697_s22 = scalar_lea.hbm %s5714_s5, 896 }
  0x41   : > { %p4698_p6 = scmp.ne.s32.totalorder %s5714_s5, %s4697_s22  ;;  %p4704_p1 = scmp.lt.u32.totalorder %s4697_s22, %s5714_s5 }
  0x43   : > { %p4700_p8 = pnand %p4698_p6, %p5034_p7 }
  0x45   : > { %p4701_p9 = pneg %p4700_p8 }
  0x47   : > { %p4706_p3 = pnand %p4704_p1, %p4701_p9 }
  0x49   : > { %4709 = shalt.err (!%p4706_p3)
}
  0x4a   : > { %s4710_s15 = scalar_lea.vmem %s5024_s18, 896  ;;  %p4718_p13 = scmp.lt.s32.totalorder %s5024_s18, %s5024_s18 }
  0x4b   : > { %p4711_p10 = scmp.ne.s32.totalorder %s5024_s18, %s4710_s15  ;;  %p4719_p0 = scmp.lt.s32.totalorder %s4710_s15, %s4710_s15 }
  0x4d   : > { %p4713_p11 = pnand %p4711_p10, %p5034_p7  ;;  %p4720_p2 = por %p4719_p0, %p4718_p13 }
  0x4f   : > { %p4714_p12 = pneg %p4713_p11 }
  0x51   : > { %p4721_p4 = pnand %p4720_p2, %p4714_p12 }
  0x53   : > { %4724 = shalt.err (!%p4721_p4)
}
  0x54   : > { %4570 = dma.hbm_to_vmem [thread:$0]  (!%p5020_p5), %s5714_s5, 896, %s5024_s18, [#allocation11], %s4922_s9, %s4922_s9, %s4923_s14  }
  0x55   : > { %s4924_s20 = smov [#allocation2]   ;;  %s4925_s22 = smov [#allocation6]  }
  0x56   : > { %s242_s21 = sshll.u32 %s4924_s20, 4  ;;  %s264_s23 = sshll.u32 %s4925_s22, 4  ;;  %s243_s21 = int_to_ptr.vmem [resolvable:$true] %s242_s21  ;;  %s265_s23 = int_to_ptr.vmem [resolvable:$true] %s264_s23 }
  0x57   : > { %s4725_s10 = scalar_lea.hbm %s5709_s0, 16 }
  0x58   : > { %p4726_p6 = scmp.ne.s32.totalorder %s5709_s0, %s4725_s10  ;;  %p4732_p1 = scmp.lt.u32.totalorder %s4725_s10, %s5709_s0 }
  0x5a   : > { %p4728_p8 = pnand %p4726_p6, %p5034_p7 }
  0x5c   : > { %p4729_p9 = pneg %p4728_p8 }
  0x5e   : > { %p4734_p3 = pnand %p4732_p1, %p4729_p9 }
  0x60   : > { %4737 = shalt.err (!%p4734_p3)
}
  0x61   : > { %s4738_s18 = scalar_lea.vmem %s243_s21, 16  ;;  %s4745_s9 = scalar_lea.vmem %s243_s21, 32 }
  0x62   : > { %p4739_p10 = scmp.ne.s32.totalorder %s243_s21, %s4738_s18  ;;  %p4746_p13 = scmp.lt.s32.totalorder %s243_s21, %s243_s21 }
  0x63   : > { %p4747_p0 = scmp.lt.s32.totalorder %s4745_s9, %s4738_s18 }
  0x64   : > { %p4741_p11 = pnand %p4739_p10, %p5034_p7 }
  0x65   : > { %p4748_p2 = por %p4747_p0, %p4746_p13 }
  0x66   : > { %p4742_p12 = pneg %p4741_p11 }
  0x68   : > { %p4749_p4 = pnand %p4748_p2, %p4742_p12 }
  0x6a   : > { %4752 = shalt.err (!%p4749_p4)
}
  0x6b   : > { %4555 = dma.hbm_to_vmem [thread:$0]  (!%p5020_p5), %s5709_s0, 16, %s243_s21, [#allocation3]  }
  0x6c   : > { %s4753_s20 = scalar_lea.hbm %s5711_s2, 16 }
  0x6d   : > { %p4754_p6 = scmp.ne.s32.totalorder %s5711_s2, %s4753_s20  ;;  %p4760_p1 = scmp.lt.u32.totalorder %s4753_s20, %s5711_s2 }
  0x6f   : > { %p4756_p8 = pnand %p4754_p6, %p5034_p7 }
  0x71   : > { %p4757_p9 = pneg %p4756_p8 }
  0x73   : > { %p4762_p3 = pnand %p4760_p1, %p4757_p9 }
  0x75   : > { %4765 = shalt.err (!%p4762_p3)
}
  0x76   : > { %s4766_s15 = scalar_lea.vmem %s265_s23, 16  ;;  %s4773_s21 = scalar_lea.vmem %s265_s23, 32 }
  0x77   : > { %p4767_p10 = scmp.ne.s32.totalorder %s265_s23, %s4766_s15  ;;  %p4774_p13 = scmp.lt.s32.totalorder %s265_s23, %s265_s23 }
  0x78   : > { %p4775_p0 = scmp.lt.s32.totalorder %s4773_s21, %s4766_s15 }
  0x79   : > { %p4769_p11 = pnand %p4767_p10, %p5034_p7 }
  0x7a   : > { %p4776_p2 = por %p4775_p0, %p4774_p13 }
  0x7b   : > { %p4770_p12 = pneg %p4769_p11 }
  0x7d   : > { %p4777_p4 = pnand %p4776_p2, %p4770_p12 }
  0x7f   : > { %4780 = shalt.err (!%p4777_p4)
}
  0x80   : > { %4561 = dma.hbm_to_vmem [thread:$0]  (!%p5020_p5), %s5711_s2, 16, %s265_s23, [#allocation5]  }
  0x81   : > { %s4926_s9 = smov [#allocation9]   ;;  %s4927_s14 = smov [#allocation12]  }
  0x82   : > { %s288_s11 = sshll.u32 %s4926_s9, 4  ;;  %s312_s1 = sshll.u32 %s4927_s14, 4  ;;  %s289_s11 = int_to_ptr.vmem [resolvable:$true] %s288_s11  ;;  %s313_s1 = int_to_ptr.vmem [resolvable:$true] %s312_s1 }
  0x83   : > { %s4781_s22 = scalar_lea.hbm %s5713_s4, 16 }
  0x84   : > { %p4782_p6 = scmp.ne.s32.totalorder %s5713_s4, %s4781_s22  ;;  %p4788_p1 = scmp.lt.u32.totalorder %s4781_s22, %s5713_s4 }
  0x86   : > { %p4784_p8 = pnand %p4782_p6, %p5034_p7 }
  0x88   : > { %p4785_p9 = pneg %p4784_p8 }
  0x8a   : > { %p4790_p3 = pnand %p4788_p1, %p4785_p9 }
  0x8c   : > { %4793 = shalt.err (!%p4790_p3)
}
  0x8d   : > { %s4794_s23 = scalar_lea.vmem %s289_s11, 16  ;;  %s4801_s21 = scalar_lea.vmem %s289_s11, 32 }
  0x8e   : > { %p4795_p10 = scmp.ne.s32.totalorder %s289_s11, %s4794_s23  ;;  %p4802_p13 = scmp.lt.s32.totalorder %s289_s11, %s289_s11 }
  0x8f   : > { %p4803_p0 = scmp.lt.s32.totalorder %s4801_s21, %s4794_s23 }
  0x90   : > { %p4797_p11 = pnand %p4795_p10, %p5034_p7 }
  0x91   : > { %p4804_p2 = por %p4803_p0, %p4802_p13 }
  0x92   : > { %p4798_p12 = pneg %p4797_p11 }
  0x94   : > { %p4805_p4 = pnand %p4804_p2, %p4798_p12 }
  0x96   : > { %4808 = shalt.err (!%p4805_p4)
}
  0x97   : > { %4567 = dma.hbm_to_vmem [thread:$0]  (!%p5020_p5), %s5713_s4, 16, %s289_s11, [#allocation8]  }
  0x98   : > { %s4809_s19 = scalar_lea.hbm %s5715_s6, 16 }
  0x99   : > { %p4810_p6 = scmp.ne.s32.totalorder %s5715_s6, %s4809_s19  ;;  %p4816_p1 = scmp.lt.u32.totalorder %s4809_s19, %s5715_s6 }
  0x9b   : > { %p4812_p8 = pnand %p4810_p6, %p5034_p7 }
  0x9d   : > { %p4813_p9 = pneg %p4812_p8 }
  0x9f   : > { %p4818_p3 = pnand %p4816_p1, %p4813_p9 }
  0xa1   : > { %4821 = shalt.err (!%p4818_p3)
}
  0xa2   : > { %s4822_s10 = scalar_lea.vmem %s313_s1, 16  ;;  %s4829_s11 = scalar_lea.vmem %s313_s1, 32 }
  0xa3   : > { %p4823_p10 = scmp.ne.s32.totalorder %s313_s1, %s4822_s10  ;;  %p4830_p13 = scmp.lt.s32.totalorder %s313_s1, %s313_s1 }
  0xa4   : > { %p4831_p0 = scmp.lt.s32.totalorder %s4829_s11, %s4822_s10 }
  0xa5   : > { %p4825_p11 = pnand %p4823_p10, %p5034_p7 }
  0xa6   : > { %p4832_p2 = por %p4831_p0, %p4830_p13 }
  0xa7   : > { %p4826_p12 = pneg %p4825_p11 }
  0xa9   : > { %p4833_p4 = pnand %p4832_p2, %p4826_p12 }
  0xab   : > { %4836 = shalt.err (!%p4833_p4)
}
  0xac   : > { %4573 = dma.hbm_to_vmem [thread:$0]  (!%p5020_p5), %s5715_s6, 16, %s313_s1, [#allocation11]  }
  0xad   : > { %s5169_s24 = sadd.s32 1, %s4917_s30   ;;  %s179_s21 = sadd.s32 1, %s4913_s29 }
  0xae   : > { %s176_s16 = ssub.s32 %s4917_s30, %s5169_s24  ;;  %p186_p6 = scmp.ne.s32.totalorder %s4913_s29, %s4909_s28 }
  0xaf   : > { %p177_p7 = scmp.eq.s32.totalorder %s176_s16, 0  ;;  %p187_p8 = scmp.eq.s32.totalorder %s4917_s30, 0 }
  0xb0   : > { %p192_p9 = scmp.ne.s32.totalorder %s4909_s28, %s4905_s27  ;;  %p5728_p3 = scmp.ne.s32.totalorder %s5723_s12, 0 }
  0xb1   : > { %s5180_s17 = scalar_select %p177_p7, %s4913_s29, %s179_s21  }
  0xb2   : > { %p188_p1 = por %p187_p8, %p186_p6  ;;  %p5184_p10 = por %p5728_p3, %p192_p9 }
  0xb3   : > { %p4585_p11 = scmp.lt.s32.totalorder %s4917_s30, 17  ;;  %s323_s9 = sand.u32 1, %s4913_s29  }
  0xb4   : > { %s4137_s1 = sshll.u32 %s323_s9, 11  ;;  %s4446_s14 = sshll.u32 %s4917_s30, 15 }
  0xb5   : > { %s5194_s22 = scalar_lea.hbm %s5716_s7, %s4446_s14  ;;  %s327_s27 = scalar_lea.vmem [#allocation13], %s4137_s1 }
  0xb6   : > { %s334_s25 = sshll.u32 %s327_s27, 4  ;;  %p5198_p5 = pnand %p4585_p11, %p188_p1  ;;  %s5196_s25 = int_to_ptr.vmem [resolvable:$true] %s334_s25 }
  0xb7   : > { %s5202_s10 = scalar_lea.sflag [#allocation14], %s323_s9  ;;  %s4837_s11 = scalar_lea.hbm %s5194_s22, 32768 }
  0xb8   : > { %p4838_p12 = scmp.ne.s32.totalorder %s5194_s22, %s4837_s11  ;;  %p4839_p13 = pneg %p5198_p5 }
  0xb9   : > { %s4842_s16 = scalar_lea.hbm %s5716_s7, 557056  ;;  %p4843_p4 = scmp.lt.u32.totalorder %s5194_s22, %s5716_s7 }
  0xba   : > { %p4840_p0 = pnand %p4839_p13, %p4838_p12  ;;  %p4844_p7 = scmp.lt.u32.totalorder %s4842_s16, %s4837_s11 }
  0xbb   : > { %p4846_p8 = scmp.lt.u32.totalorder %s4837_s11, %s5194_s22 }
  0xbc   : > { %p4841_p2 = pneg %p4840_p0  ;;  %p4845_p6 = por %p4844_p7, %p4843_p4 }
  0xbe   : > { %p4847_p9 = por %p4846_p8, %p4845_p6 }
  0xc0   : > { %p4848_p1 = pnand %p4847_p9, %p4841_p2 }
  0xc2   : > { %4851 = shalt.err (!%p4848_p1)
}
  0xc3   : > { %s4852_s9 = scalar_lea.vmem %s5196_s25, 32768  ;;  %s4928_s14 = smov [#allocation13]  }
  0xc4   : > { %p4853_p3 = scmp.ne.s32.totalorder %s5196_s25, %s4852_s9  ;;  %s4857_s19 = sshll.u32 %s4928_s14, 4  ;;  %s4858_s19 = int_to_ptr.vmem [resolvable:$false] %s4857_s19 }
  0xc5   : > { %s4859_s20 = scalar_lea.vmem %s4858_s19, 65536  ;;  %p4860_p0 = scmp.lt.s32.totalorder %s5196_s25, %s4858_s19 }
  0xc6   : > { %p4855_p11 = pnand %p4853_p3, %p4839_p13  ;;  %p4861_p4 = scmp.lt.s32.totalorder %s4859_s20, %s4852_s9 }
  0xc8   : > { %p4856_p12 = pneg %p4855_p11  ;;  %p4862_p7 = por %p4861_p4, %p4860_p0 }
  0xca   : > { %p4863_p6 = pnand %p4862_p7, %p4856_p12 }
  0xcc   : > { %4866 = shalt.err (!%p4863_p6)
}
  0xcd   : > { %s4929_s27 = smov 4096   ;;  %s4930_s11 = smov 256  }
  0xce   : > { %4577 = dma.hbm_to_vmem [thread:$0]  (!%p5198_p5), %s5194_s22, 32768, %s5196_s25, %s5202_s10, %s4929_s27, %s4929_s27, %s4930_s11  }
  0xcf   : > { %p5731_p13 = scmp.ne.s32.totalorder %s5724_s13, 0 }
  0xd0   : > { %p5732_p2 = scmp.ne.s32.totalorder (!%p5731_p13), %s5723_s12, 0 }
  0xd1   : > { %346 = sbr.rel (%p5731_p13) target bundleno = 1343 (0x53f), region = 52 }
  0xd8   : > { %4884 = dma.done.wait (%p5732_p2), [#allocation3], 16  }
  0xd9   : > { %4886 = vsyncadd (%p5732_p2), [#allocation3], 4294967280 }
  0xda   : > { %4888 = dma.done.wait (%p5732_p2), [#allocation5], 144  }
  0xdb   : > { %4890 = vsyncadd (%p5732_p2), [#allocation5], 4294967152 }
  0xdc   : > { %4892 = dma.done.wait (%p5732_p2), [#allocation8], 912  }
  0xdd   : > { %4894 = vsyncadd (%p5732_p2), [#allocation8], 4294966384 }
  0xde   : > { %4896 = dma.done.wait (%p5732_p2), [#allocation11], 912  }
  0xdf   : > { %4898 = vsyncadd (%p5732_p2), [#allocation11], 4294966384  ;;  %s376_s13 = sand.u32 1, %s4909_s28  }
  0xe0   : > { %s4148_s22 = sshll.u32 %s376_s13, 11  ;;  %s377_s25 = scalar_lea.sflag [#allocation14], %s376_s13 }
  0xe1   : > { %s5249_s26 = scalar_lea.vmem [#allocation13], %s4148_s22 }
  0xe2   : > { %4900 = dma.done.wait (%p5184_p10), %s377_s25, 32768  }
  0xe3   : > { %4902 = vsyncadd (%p5184_p10), %s377_s25, 4294934528  ;;  %v4931_v0 = vmov 0.0   ;;  %vm4932_vm0 = vmmov 0   ;;  %v4933_v1 = vmov 0.0|0.0   ;;  %vm425_vm1 = vcmask 1046528   ;;  %v500_v4 = vld [vmem:[#allocation7] sm:$0xff] }
  0xe4   : > { %4465 = vmatprep.subr.mxu0 %v4931_v0  ;;  %4467 = vmatprep.mubr.msk.f32.mxu0 %vm4932_vm0, %v4931_v0  ;;  %vm421_vm2 = vcmask 56320   ;;  %v419_v2 = vld [vmem:[#allocation4] sm:$0x7f]  ;;  %v418_v3 = vld [vmem:[#allocation2] sm:$0x1]  ;;  %v501_v5 = vld [vmem:[#allocation7 + $0x8] sm:$0xff] }
  0xe5   : > { %4504 = vmatprep.subr.bf16.mxu1 %v4933_v1  ;;  %4484 = vmatprep.mubr.msk.f32.mxu1 %vm4932_vm0, %v4931_v0  ;;  %v502_v6 = vld [vmem:[#allocation7 + $0x10] sm:$0xff]  ;;  %v503_v7 = vld [vmem:[#allocation7 + $0x18] sm:$0xff]  ;;  %v4505_v8 = vpack.c.bf16 %v501_v5, %v500_v4  ;;  %v504_v10 = vld [vmem:[#allocation7 + $0x20] sm:$0xff]  ;;  %vm512_vm3 = vcmask 1041408   ;;  %vm508_vm4 = vcmask 408576   ;;  %vm2208_vm5 = vcmask 523264  }
  0xe6   : > { %4466 = vmatpush3.msk.msra.mxu0 %vm425_vm1, %v419_v2  ;;  %v4508_v9 = vpack.c.bf16 %v503_v7, %v502_v6  ;;  %v505_v11 = vld [vmem:[#allocation7 + $0x28] sm:$0xff]  ;;  %v506_v13 = vld [vmem:[#allocation7 + $0x30] sm:$0x3]  ;;  %v587_v14 = vld [vmem:[#allocation10] sm:$0xff]  ;;  %s5733_s12 = sadd.s32 4294967295, %s4917_s30  }
  0xe7   : > { %4468 = vmatmul.mubr.msk.f32.vlgmr.msra.gmra.mrb[0].mxu0 %vm421_vm2, %v418_v3  ;;  %4513 = vmatprep.subr.bf16.mxu0 %v4933_v1  ;;  %v4511_v12 = vpack.c.bf16 %v505_v11, %v504_v10  ;;  %v588_v15 = vld [vmem:[#allocation10 + $0x8] sm:$0xff]  ;;  %v589_v16 = vld [vmem:[#allocation10 + $0x10] sm:$0xff]  ;;  %v590_v18 = vld [vmem:[#allocation10 + $0x18] sm:$0xff]  ;;  %v4934_v10 = vmov 0   ;;  %s5618_s18 = sshll.u32 %s5733_s12, 6 }
  0xe8   : > { %4501 = vmatprep.mubr.msk.f32.mxu0 %vm4932_vm0, %v4931_v0  ;;  %4506 = vmatpush3.bf16.msra.mxu1 %v4505_v8  ;;  %v4514_v17 = vpack.c.bf16 %v588_v15, %v587_v14  ;;  %v4517_v19 = vpack.c.bf16 %v590_v18, %v589_v16  ;;  %v420_v20 = vld [vmem:[#allocation6] sm:$0x1]  ;;  %v592_v26 = vld [vmem:[#allocation10 + $0x28] sm:$0xff]  ;;  %v593_v28 = vld [vmem:[#allocation10 + $0x30] sm:$0x3]  ;;  %p413_p10 = scmp.lt.s32.totalorder %s5618_s18, 1087 }
  0xe9   : > { %4507 = vmatprep.subr.bf16.mxu1 %v4933_v1  ;;  %v591_v25 = vld [vmem:[#allocation10 + $0x20] sm:$0xff]  ;;  %v507_v45 = vld [vmem:[#allocation9] sm:$0x1]  ;;  %v674_v2 = vld [vmem:[%s5249_s26 + $0x10] sm:$0xff] }
  0xea   : > { %4515 = vmatpush3.bf16.msra.mxu0 %v4514_v17  ;;  %v4520_v27 = vpack.c.bf16 %v592_v26, %v591_v25  ;;  %v672_v29 = vld [vmem:[%s5249_s26] sm:$0xff]  ;;  %v673_v31 = vld [vmem:[%s5249_s26 + $0x8] sm:$0xff]  ;;  %v706_v3 = vld [vmem:[%s5249_s26 + $0x110] sm:$0xff]  ;;  %s5739_s18 = smov (!%p413_p10, %s5618_s18), 1087 }
  0xeb   : > { %4516 = vmatprep.subr.bf16.mxu0 %v4933_v1  ;;  %v704_v30 = vld [vmem:[%s5249_s26 + $0x100] sm:$0xff]  ;;  %v705_v34 = vld [vmem:[%s5249_s26 + $0x108] sm:$0xff]  ;;  %v675_v4 = vld [vmem:[%s5249_s26 + $0x18] sm:$0xff]  ;;  %v4161_v5 = vcombine.high %v674_v2, %v706_v3  ;;  %v4160_v7 = vcombine.low %v674_v2, %v706_v3  ;;  %s5640_s15 = scalar_lea.vmem %s5717_s8, %s5739_s18 }
  0xec   : > { %4509 = vmatpush3.bf16.msra.mxu1 %v4508_v9  ;;  %v4156_v32 = vcombine.low %v672_v29, %v704_v30  ;;  %v4157_v33 = vcombine.high %v672_v29, %v704_v30  ;;  %v736_v35 = vld [vmem:[%s5249_s26 + $0x200] sm:$0xff]  ;;  %v4158_v37 = vcombine.low %v673_v31, %v705_v34  ;;  %v4159_v38 = vcombine.high %v673_v31, %v705_v34  ;;  %v737_v47 = vld [vmem:[%s5249_s26 + $0x208] sm:$0xff]  ;;  %v707_v6 = vld [vmem:[%s5249_s26 + $0x118] sm:$0xff] }
  0xed   : > { %4510 = vmatprep.subr.bf16.mxu1 %v4933_v1  ;;  %v768_v36 = vld [vmem:[%s5249_s26 + $0x300] sm:$0xff]  ;;  %v769_v48 = vld [vmem:[%s5249_s26 + $0x308] sm:$0xff]  ;;  %v4162_v8 = vcombine.low %v675_v4, %v707_v6  ;;  %v4163_v9 = vcombine.high %v675_v4, %v707_v6  ;;  %v594_v11 = vld [vmem:[#allocation12] sm:$0x1] }
  0xee   : > { %4518 = vmatpush3.bf16.msra.mxu0 %v4517_v19  ;;  %v4221_v39 = vcombine.high %v736_v35, %v768_v36  ;;  %v4220_v40 = vcombine.low %v736_v35, %v768_v36  ;;  %v800_v41 = vld [vmem:[%s5249_s26 + $0x400] sm:$0xff]  ;;  %v4223_v52 = vcombine.high %v737_v47, %v769_v48  ;;  %v801_v53 = vld [vmem:[%s5249_s26 + $0x408] sm:$0xff]  ;;  %v4222_v55 = vcombine.low %v737_v47, %v769_v48  ;;  %v770_v14 = vld [vmem:[%s5249_s26 + $0x310] sm:$0xff] }
  0xef   : > { %4519 = vmatprep.subr.bf16.mxu0 %v4933_v1  ;;  %v832_v42 = vld [vmem:[%s5249_s26 + $0x500] sm:$0xff]  ;;  %v833_v54 = vld [vmem:[%s5249_s26 + $0x508] sm:$0xff]  ;;  %v739_v15 = vld [vmem:[%s5249_s26 + $0x218] sm:$0xff] }
  0xf0   : > { %4512 = vmatpush3.bf16.msra.mxu1 %v4511_v12  ;;  %v4285_v43 = vcombine.high %v800_v41, %v832_v42  ;;  %v4284_v44 = vcombine.low %v800_v41, %v832_v42  ;;  %v4287_v56 = vcombine.high %v801_v53, %v833_v54  ;;  %v4286_v57 = vcombine.low %v801_v53, %v833_v54  ;;  %v864_v58 = vld [vmem:[%s5249_s26 + $0x600] sm:$0xff]  ;;  %v865_v60 = vld [vmem:[%s5249_s26 + $0x608] sm:$0xff]  ;;  %v738_v12 = vld [vmem:[%s5249_s26 + $0x210] sm:$0xff] }
  0xf1   : > { %4482 = vmatprep.subr.mxu1 %v4931_v0  ;;  %v896_v59 = vld [vmem:[%s5249_s26 + $0x700] sm:$0xff]  ;;  %v897_v62 = vld [vmem:[%s5249_s26 + $0x708] sm:$0xff]  ;;  %v771_v16 = vld [vmem:[%s5249_s26 + $0x318] sm:$0xff]  ;;  %v4224_v26 = vcombine.low %v738_v12, %v770_v14 }
  0xf2   : > { %4521 = vmatpush3.bf16.msra.mxu0 %v4520_v27  ;;  %v4349_v61 = vcombine.high %v864_v58, %v896_v59  ;;  %v4348_v63 = vcombine.low %v864_v58, %v896_v59  ;;  %v4351_v1 = vcombine.high %v865_v60, %v897_v62  ;;  %v835_v25 = vld [vmem:[%s5249_s26 + $0x518] sm:$0xff]  ;;  %v4226_v27 = vcombine.low %v739_v15, %v771_v16  ;;  %v866_v30 = vld [vmem:[%s5249_s26 + $0x610] sm:$0xff]  ;;  %v709_v41 = vld [vmem:[%s5249_s26 + $0x128] sm:$0xff] }
  0xf3   : > { %4499 = vmatprep.subr.mxu0 %v4931_v0  ;;  %v4350_v0 = vcombine.low %v865_v60, %v897_v62  ;;  %v898_v31 = vld [vmem:[%s5249_s26 + $0x710] sm:$0xff]  ;;  %v772_v47 = vld [vmem:[%s5249_s26 + $0x320] sm:$0xff]  ;;  %v741_v48 = vld [vmem:[%s5249_s26 + $0x228] sm:$0xff] }
  0xf4   : > { %4483 = vmatpush3.msk.msra.mxu1 %vm512_vm3, %v506_v13  ;;  %v4353_v36 = vcombine.high %v866_v30, %v898_v31  ;;  %v4352_v42 = vcombine.low %v866_v30, %v898_v31  ;;  %v804_v54 = vld [vmem:[%s5249_s26 + $0x420] sm:$0xff]  ;;  %v678_v6 = vld [vmem:[%s5249_s26 + $0x30] sm:$0xff] }
  0xf5   : > { %2212 = vmatprep.subr.bf16.mxu1 %v4157_v33  ;;  %v899_v33 = vld [vmem:[%s5249_s26 + $0x718] sm:$0xff]  ;;  %v868_v62 = vld [vmem:[%s5249_s26 + $0x620] sm:$0xff] }
  0xf6   : > { %4500 = vmatpush3.msk.msra.mxu0 %vm512_vm3, %v593_v28 }
  0xf7   : > { %2253 = vmatprep.subr.bf16.mxu0 %v4159_v38  ;;  %v676_v38 = vld [vmem:[%s5249_s26 + $0x20] sm:$0xff] }
 0x1ba   : > { %v495_v21 = vpop.f32.mrb[0].mxu0 }
 0x1bb   : > { %v496_v22 = vadd.f32 %v495_v21, %v420_v20  ;;  %v4469_v23 = vpop.f32.mrb[1].mxu0  ;;  %v4225_v20 = vcombine.high %v738_v12, %v770_v14  ;;  %v4227_v21 = vcombine.high %v739_v15, %v771_v16  ;;  %v742_v15 = vld [vmem:[%s5249_s26 + $0x230] sm:$0xff] }
 0x1bc   : > { %v834_v23 = vld [vmem:[%s5249_s26 + $0x510] sm:$0xff] }
 0x1bd   : > { %v499_v24 = vmax.f32 %v496_v22, 0.0  ;;  %v802_v22 = vld [vmem:[%s5249_s26 + $0x410] sm:$0xff] }
 0x1be   : > { %v4289_v28 = vcombine.high %v802_v22, %v834_v23  ;;  %v4288_v34 = vcombine.low %v802_v22, %v834_v23  ;;  %v774_v16 = vld [vmem:[%s5249_s26 + $0x330] sm:$0xff] }
 0x1bf   : > { %4485 = vmatmul.mubr.msk.f32.vlgmr.msra.gmra.mrb[0].mxu1 %vm508_vm4, %v499_v24  ;;  %v803_v24 = vld [vmem:[%s5249_s26 + $0x418] sm:$0xff]  ;;  %v4233_v22 = vcombine.high %v742_v15, %v774_v16 }
 0x1c0   : > { %2213 = vmatpush1.bf16.msra.mxu1 %v4156_v32  ;;  %2244 = vmatprep.mubr.bf16.mxu1 %v4934_v10  ;;  %v4291_v29 = vcombine.high %v803_v24, %v835_v25  ;;  %v867_v32 = vld [vmem:[%s5249_s26 + $0x618] sm:$0xff]  ;;  %v4290_v35 = vcombine.low %v803_v24, %v835_v25  ;;  %v806_v24 = vld [vmem:[%s5249_s26 + $0x430] sm:$0xff] }
 0x1c1   : > { %2214 = vmatprep.subr.bf16.mxu1 %v4221_v39  ;;  %v708_v39 = vld [vmem:[%s5249_s26 + $0x120] sm:$0xff]  ;;  %v838_v25 = vld [vmem:[%s5249_s26 + $0x530] sm:$0xff] }
 0x1c2   : > { %v4297_v30 = vcombine.high %v806_v24, %v838_v25 }
 0x1c4   : > { %2215 = vmatpush1.bf16.msra.mxu1 %v4220_v40  ;;  %v677_v40 = vld [vmem:[%s5249_s26 + $0x28] sm:$0xff] }
 0x1c5   : > { %2216 = vmatprep.subr.bf16.mxu1 %v4285_v43  ;;  %v4354_v43 = vcombine.low %v867_v32, %v899_v33 }
 0x1c8   : > { %2217 = vmatpush1.bf16.msra.mxu1 %v4284_v44  ;;  %v4165_v44 = vcombine.high %v676_v38, %v708_v39 }
 0x1c9   : > { %2218 = vmatprep.subr.bf16.mxu1 %v4349_v61 }
 0x1cc   : > { %2219 = vmatpush1.bf16.msra.mxu1 %v4348_v63  ;;  %v900_v63 = vld [vmem:[%s5249_s26 + $0x720] sm:$0xff] }
 0x1cd   : > { %2294 = vmatprep.subr.bf16.mxu1 %v4161_v5  ;;  %v4357_v4 = vcombine.high %v868_v62, %v900_v63 }
 0x292   : > { %v582_v46 = vpop.f32.mrb[0].mxu1 }
 0x293   : > { %v583_v49 = vadd.f32 %v582_v46, %v507_v45  ;;  %v4486_v50 = vpop.f32.mrb[1].mxu1  ;;  %v4167_v45 = vcombine.high %v677_v40, %v709_v41  ;;  %v740_v46 = vld [vmem:[%s5249_s26 + $0x220] sm:$0xff] }
 0x294   : > { %v4164_v50 = vcombine.low %v676_v38, %v708_v39  ;;  %v4228_v58 = vcombine.low %v740_v46, %v772_v47 }
 0x295   : > { %v586_v51 = vmax.f32 %v583_v49, 0.0  ;;  %v773_v49 = vld [vmem:[%s5249_s26 + $0x328] sm:$0xff] }
 0x296   : > { %v4231_v53 = vcombine.high %v741_v48, %v773_v49  ;;  %v4230_v59 = vcombine.low %v741_v48, %v773_v49  ;;  %v744_v48 = vld [vmem:[%s5249_s26 + $0x240] sm:$0xff] }
 0x297   : > { %4502 = vmatmul.mubr.msk.f32.vlgmr.msra.gmra.mrb[2].mxu0 %vm508_vm4, %v586_v51  ;;  %v4166_v51 = vcombine.low %v677_v40, %v709_v41  ;;  %v680_v40 = vld [vmem:[%s5249_s26 + $0x40] sm:$0xff] }
 0x298   : > { %2254 = vmatpush1.bf16.msra.mxu0 %v4158_v37  ;;  %2285 = vmatprep.mubr.bf16.mxu0 %v4934_v10  ;;  %v4355_v37 = vcombine.high %v867_v32, %v899_v33  ;;  %v870_v32 = vld [vmem:[%s5249_s26 + $0x630] sm:$0xff]  ;;  %v712_v41 = vld [vmem:[%s5249_s26 + $0x140] sm:$0xff] }
 0x299   : > { %2255 = vmatprep.subr.bf16.mxu0 %v4223_v52  ;;  %v4229_v52 = vcombine.high %v740_v46, %v772_v47  ;;  %v902_v33 = vld [vmem:[%s5249_s26 + $0x730] sm:$0xff]  ;;  %v4173_v46 = vcombine.high %v680_v40, %v712_v41  ;;  %v776_v49 = vld [vmem:[%s5249_s26 + $0x340] sm:$0xff] }
 0x29a   : > { %v4361_v38 = vcombine.high %v870_v32, %v902_v33 }
 0x29c   : > { %2256 = vmatpush1.bf16.msra.mxu0 %v4222_v55  ;;  %v836_v55 = vld [vmem:[%s5249_s26 + $0x520] sm:$0xff] }
 0x29d   : > { %2257 = vmatprep.subr.bf16.mxu0 %v4287_v56  ;;  %v805_v56 = vld [vmem:[%s5249_s26 + $0x428] sm:$0xff]  ;;  %v4293_v60 = vcombine.high %v804_v54, %v836_v55  ;;  %v4292_v2 = vcombine.low %v804_v54, %v836_v55  ;;  %v4237_v54 = vcombine.high %v744_v48, %v776_v49 }
 0x2a0   : > { %2258 = vmatpush1.bf16.msra.mxu0 %v4286_v57  ;;  %v837_v57 = vld [vmem:[%s5249_s26 + $0x528] sm:$0xff] }
 0x2a1   : > { %2259 = vmatprep.subr.bf16.mxu0 %v4351_v1  ;;  %v4295_v61 = vcombine.high %v805_v56, %v837_v57  ;;  %v901_v1 = vld [vmem:[%s5249_s26 + $0x728] sm:$0xff]  ;;  %v4294_v3 = vcombine.low %v805_v56, %v837_v57  ;;  %v808_v56 = vld [vmem:[%s5249_s26 + $0x440] sm:$0xff] }
 0x2a2   : > { %v840_v57 = vld [vmem:[%s5249_s26 + $0x540] sm:$0xff] }
 0x2a4   : > { %2260 = vmatpush1.bf16.msra.mxu0 %v4350_v0  ;;  %v869_v0 = vld [vmem:[%s5249_s26 + $0x628] sm:$0xff] }
 0x2a5   : > { %2335 = vmatprep.subr.bf16.mxu0 %v4163_v9  ;;  %v4359_v5 = vcombine.high %v869_v0, %v901_v1  ;;  %v711_v9 = vld [vmem:[%s5249_s26 + $0x138] sm:$0xff]  ;;  %v4358_v12 = vcombine.low %v869_v0, %v901_v1  ;;  %v872_v0 = vld [vmem:[%s5249_s26 + $0x640] sm:$0xff] }
 0x2a6   : > { %v904_v1 = vld [vmem:[%s5249_s26 + $0x740] sm:$0xff] }
 0x36a   : > { %v667_v13 = vpop.f32.mrb[2].mxu0 }
 0x36b   : > { %v668_v17 = vadd.f32 %v667_v13, %v594_v11  ;;  %v4503_v18 = vpop.f32.mrb[3].mxu0  ;;  %v4356_v11 = vcombine.low %v868_v62, %v900_v63  ;;  %v4301_v62 = vcombine.high %v808_v56, %v840_v57 }
 0x36c   : > { %v775_v18 = vld [vmem:[%s5249_s26 + $0x338] sm:$0xff] }
 0x36d   : > { %v5288_v19 = vpack.c.bf16 %v668_v17, %v668_v17  ;;  %v743_v17 = vld [vmem:[%s5249_s26 + $0x238] sm:$0xff] }
 0x36e   : > { %v4235_v23 = vcombine.high %v743_v17, %v775_v18 }
 0x36f   : > { %4412 = vmatmul.mubr.msk.bf16.vlgmr.msra.gmra.mrb[4].mxu1 %vm2208_vm5, %v5288_v19  ;;  %4413 = vmatmul.mubr.msk.bf16.vlgmr.msra.gmra.mrb[4].mxu0 %vm2208_vm5, %v5288_v19 }
 0x370   : > { %2295 = vmatpush1.bf16.msra.mxu1 %v4160_v7  ;;  %2336 = vmatpush1.bf16.msra.mxu0 %v4162_v8  ;;  %v710_v7 = vld [vmem:[%s5249_s26 + $0x130] sm:$0xff]  ;;  %v679_v8 = vld [vmem:[%s5249_s26 + $0x38] sm:$0xff] }
 0x371   : > { %2296 = vmatprep.subr.bf16.mxu1 %v4225_v20  ;;  %2337 = vmatprep.subr.bf16.mxu0 %v4227_v21  ;;  %v4169_v13 = vcombine.high %v678_v6, %v710_v7  ;;  %v4171_v14 = vcombine.high %v679_v8, %v711_v9  ;;  %v4168_v20 = vcombine.low %v678_v6, %v710_v7 }
 0x372   : > { %2326 = vmatprep.mubr.bf16.mxu1 %v4934_v10  ;;  %2367 = vmatprep.mubr.bf16.mxu0 %v4934_v10  ;;  %v4170_v21 = vcombine.low %v679_v8, %v711_v9  ;;  %v4365_v6 = vcombine.high %v872_v0, %v904_v1  ;;  %v682_v8 = vld [vmem:[%s5249_s26 + $0x50] sm:$0xff] }
 0x373   : > { %v714_v9 = vld [vmem:[%s5249_s26 + $0x150] sm:$0xff] }
 0x374   : > { %2297 = vmatpush1.bf16.msra.mxu1 %v4224_v26  ;;  %2338 = vmatpush1.bf16.msra.mxu0 %v4226_v27  ;;  %v807_v26 = vld [vmem:[%s5249_s26 + $0x438] sm:$0xff] }
 0x375   : > { %2298 = vmatprep.subr.bf16.mxu1 %v4289_v28  ;;  %2339 = vmatprep.subr.bf16.mxu0 %v4291_v29  ;;  %v839_v27 = vld [vmem:[%s5249_s26 + $0x538] sm:$0xff]  ;;  %v4232_v28 = vcombine.low %v742_v15, %v774_v16  ;;  %v4234_v29 = vcombine.low %v743_v17, %v775_v18  ;;  %v4177_v15 = vcombine.high %v682_v8, %v714_v9  ;;  %v746_v17 = vld [vmem:[%s5249_s26 + $0x250] sm:$0xff] }
 0x376   : > { %v4299_v31 = vcombine.high %v807_v26, %v839_v27  ;;  %v778_v18 = vld [vmem:[%s5249_s26 + $0x350] sm:$0xff] }
 0x378   : > { %2299 = vmatpush1.bf16.msra.mxu1 %v4288_v34  ;;  %2340 = vmatpush1.bf16.msra.mxu0 %v4290_v35  ;;  %v871_v34 = vld [vmem:[%s5249_s26 + $0x638] sm:$0xff] }
 0x379   : > { %2300 = vmatprep.subr.bf16.mxu1 %v4353_v36  ;;  %2341 = vmatprep.subr.bf16.mxu0 %v4355_v37  ;;  %v903_v35 = vld [vmem:[%s5249_s26 + $0x738] sm:$0xff]  ;;  %v4296_v36 = vcombine.low %v806_v24, %v838_v25  ;;  %v4298_v37 = vcombine.low %v807_v26, %v839_v27  ;;  %v4241_v24 = vcombine.high %v746_v17, %v778_v18  ;;  %v810_v26 = vld [vmem:[%s5249_s26 + $0x450] sm:$0xff] }
 0x37a   : > { %v4363_v39 = vcombine.high %v871_v34, %v903_v35  ;;  %v842_v27 = vld [vmem:[%s5249_s26 + $0x550] sm:$0xff] }
 0x37c   : > { %2301 = vmatpush1.bf16.msra.mxu1 %v4352_v42  ;;  %2342 = vmatpush1.bf16.msra.mxu0 %v4354_v43  ;;  %v681_v42 = vld [vmem:[%s5249_s26 + $0x48] sm:$0xff] }
 0x37d   : > { %2376 = vmatprep.subr.bf16.mxu1 %v4165_v44  ;;  %2417 = vmatprep.subr.bf16.mxu0 %v4167_v45  ;;  %v713_v43 = vld [vmem:[%s5249_s26 + $0x148] sm:$0xff]  ;;  %v4360_v44 = vcombine.low %v870_v32, %v902_v33  ;;  %v4362_v45 = vcombine.low %v871_v34, %v903_v35  ;;  %v4305_v32 = vcombine.high %v810_v26, %v842_v27  ;;  %v874_v34 = vld [vmem:[%s5249_s26 + $0x650] sm:$0xff] }
 0x37e   : > { %v4175_v47 = vcombine.high %v681_v42, %v713_v43  ;;  %v906_v35 = vld [vmem:[%s5249_s26 + $0x750] sm:$0xff] }
 0x37f   : > { %4414 = vmatmul.mubr.msk.bf16.vlgmr.msra.gmra.mrb[8].mxu1 %vm2208_vm5, %v5288_v19  ;;  %4415 = vmatmul.mubr.msk.bf16.vlgmr.msra.gmra.mrb[8].mxu0 %vm2208_vm5, %v5288_v19 }
 0x380   : > { %2377 = vmatpush1.bf16.msra.mxu1 %v4164_v50  ;;  %2418 = vmatpush1.bf16.msra.mxu0 %v4166_v51  ;;  %v745_v50 = vld [vmem:[%s5249_s26 + $0x248] sm:$0xff] }
 0x381   : > { %2378 = vmatprep.subr.bf16.mxu1 %v4229_v52  ;;  %2419 = vmatprep.subr.bf16.mxu0 %v4231_v53  ;;  %v777_v51 = vld [vmem:[%s5249_s26 + $0x348] sm:$0xff]  ;;  %v4172_v52 = vcombine.low %v680_v40, %v712_v41  ;;  %v4174_v53 = vcombine.low %v681_v42, %v713_v43  ;;  %v4369_v40 = vcombine.high %v874_v34, %v906_v35  ;;  %v684_v42 = vld [vmem:[%s5249_s26 + $0x60] sm:$0xff] }
 0x382   : > { %2408 = vmatprep.mubr.bf16.mxu1 %v4934_v10  ;;  %2449 = vmatprep.mubr.bf16.mxu0 %v4934_v10  ;;  %v4239_v55 = vcombine.high %v745_v50, %v777_v51  ;;  %v716_v43 = vld [vmem:[%s5249_s26 + $0x160] sm:$0xff] }
 0x384   : > { %2379 = vmatpush1.bf16.msra.mxu1 %v4228_v58  ;;  %2420 = vmatpush1.bf16.msra.mxu0 %v4230_v59  ;;  %v809_v58 = vld [vmem:[%s5249_s26 + $0x448] sm:$0xff] }
 0x385   : > { %2380 = vmatprep.subr.bf16.mxu1 %v4293_v60  ;;  %2421 = vmatprep.subr.bf16.mxu0 %v4295_v61  ;;  %v841_v59 = vld [vmem:[%s5249_s26 + $0x548] sm:$0xff]  ;;  %v4236_v60 = vcombine.low %v744_v48, %v776_v49  ;;  %v4238_v61 = vcombine.low %v745_v50, %v777_v51  ;;  %v4181_v48 = vcombine.high %v684_v42, %v716_v43  ;;  %v748_v50 = vld [vmem:[%s5249_s26 + $0x260] sm:$0xff] }
 0x386   : > { %v4303_v63 = vcombine.high %v809_v58, %v841_v59  ;;  %v780_v51 = vld [vmem:[%s5249_s26 + $0x360] sm:$0xff] }
 0x388   : > { %2381 = vmatpush1.bf16.msra.mxu1 %v4292_v2  ;;  %2422 = vmatpush1.bf16.msra.mxu0 %v4294_v3  ;;  %v873_v2 = vld [vmem:[%s5249_s26 + $0x648] sm:$0xff] }
 0x389   : > { %2382 = vmatprep.subr.bf16.mxu1 %v4357_v4  ;;  %2423 = vmatprep.subr.bf16.mxu0 %v4359_v5  ;;  %v905_v3 = vld [vmem:[%s5249_s26 + $0x748] sm:$0xff]  ;;  %v4300_v4 = vcombine.low %v808_v56, %v840_v57  ;;  %v4302_v5 = vcombine.low %v809_v58, %v841_v59  ;;  %v4245_v56 = vcombine.high %v748_v50, %v780_v51  ;;  %v812_v58 = vld [vmem:[%s5249_s26 + $0x460] sm:$0xff] }
 0x38a   : > { %v4367_v7 = vcombine.high %v873_v2, %v905_v3  ;;  %v844_v59 = vld [vmem:[%s5249_s26 + $0x560] sm:$0xff] }
 0x38c   : > { %2383 = vmatpush1.bf16.msra.mxu1 %v4356_v11  ;;  %2424 = vmatpush1.bf16.msra.mxu0 %v4358_v12  ;;  %v683_v11 = vld [vmem:[%s5249_s26 + $0x58] sm:$0xff] }
 0x38d   : > { %2458 = vmatprep.subr.bf16.mxu1 %v4169_v13  ;;  %2499 = vmatprep.subr.bf16.mxu0 %v4171_v14  ;;  %v715_v12 = vld [vmem:[%s5249_s26 + $0x158] sm:$0xff]  ;;  %v4364_v13 = vcombine.low %v872_v0, %v904_v1  ;;  %v4366_v14 = vcombine.low %v873_v2, %v905_v3  ;;  %v4309_v0 = vcombine.high %v812_v58, %v844_v59  ;;  %v876_v2 = vld [vmem:[%s5249_s26 + $0x660] sm:$0xff] }
 0x38e   : > { %v4179_v16 = vcombine.high %v683_v11, %v715_v12  ;;  %v908_v3 = vld [vmem:[%s5249_s26 + $0x760] sm:$0xff] }
 0x38f   : > { %4416 = vmatmul.mubr.msk.bf16.vlgmr.msra.gmra.mrb[12].mxu1 %vm2208_vm5, %v5288_v19  ;;  %4417 = vmatmul.mubr.msk.bf16.vlgmr.msra.gmra.mrb[12].mxu0 %vm2208_vm5, %v5288_v19 }
 0x390   : > { %2459 = vmatpush1.bf16.msra.mxu1 %v4168_v20  ;;  %2500 = vmatpush1.bf16.msra.mxu0 %v4170_v21  ;;  %v747_v20 = vld [vmem:[%s5249_s26 + $0x258] sm:$0xff] }
 0x391   : > { %2460 = vmatprep.subr.bf16.mxu1 %v4233_v22  ;;  %2501 = vmatprep.subr.bf16.mxu0 %v4235_v23  ;;  %v779_v21 = vld [vmem:[%s5249_s26 + $0x358] sm:$0xff]  ;;  %v4176_v22 = vcombine.low %v682_v8, %v714_v9  ;;  %v4178_v23 = vcombine.low %v683_v11, %v715_v12  ;;  %v4373_v8 = vcombine.high %v876_v2, %v908_v3  ;;  %v686_v11 = vld [vmem:[%s5249_s26 + $0x70] sm:$0xff] }
 0x392   : > { %2490 = vmatprep.mubr.bf16.mxu1 %v4934_v10  ;;  %2531 = vmatprep.mubr.bf16.mxu0 %v4934_v10  ;;  %v4243_v25 = vcombine.high %v747_v20, %v779_v21  ;;  %v718_v12 = vld [vmem:[%s5249_s26 + $0x170] sm:$0xff] }
 0x394   : > { %2461 = vmatpush1.bf16.msra.mxu1 %v4232_v28  ;;  %2502 = vmatpush1.bf16.msra.mxu0 %v4234_v29  ;;  %v811_v28 = vld [vmem:[%s5249_s26 + $0x458] sm:$0xff] }
 0x395   : > { %2462 = vmatprep.subr.bf16.mxu1 %v4297_v30  ;;  %2503 = vmatprep.subr.bf16.mxu0 %v4299_v31  ;;  %v843_v29 = vld [vmem:[%s5249_s26 + $0x558] sm:$0xff]  ;;  %v4240_v30 = vcombine.low %v746_v17, %v778_v18  ;;  %v4242_v31 = vcombine.low %v747_v20, %v779_v21  ;;  %v4185_v17 = vcombine.high %v686_v11, %v718_v12  ;;  %v750_v20 = vld [vmem:[%s5249_s26 + $0x270] sm:$0xff] }
 0x396   : > { %v4307_v33 = vcombine.high %v811_v28, %v843_v29  ;;  %v782_v21 = vld [vmem:[%s5249_s26 + $0x370] sm:$0xff] }
 0x398   : > { %2463 = vmatpush1.bf16.msra.mxu1 %v4296_v36  ;;  %2504 = vmatpush1.bf16.msra.mxu0 %v4298_v37  ;;  %v875_v36 = vld [vmem:[%s5249_s26 + $0x658] sm:$0xff] }
 0x399   : > { %2464 = vmatprep.subr.bf16.mxu1 %v4361_v38  ;;  %2505 = vmatprep.subr.bf16.mxu0 %v4363_v39  ;;  %v907_v37 = vld [vmem:[%s5249_s26 + $0x758] sm:$0xff]  ;;  %v4304_v38 = vcombine.low %v810_v26, %v842_v27  ;;  %v4306_v39 = vcombine.low %v811_v28, %v843_v29  ;;  %v4249_v26 = vcombine.high %v750_v20, %v782_v21  ;;  %v814_v28 = vld [vmem:[%s5249_s26 + $0x470] sm:$0xff] }
 0x39a   : > { %v4371_v41 = vcombine.high %v875_v36, %v907_v37  ;;  %v846_v29 = vld [vmem:[%s5249_s26 + $0x570] sm:$0xff] }
 0x39c   : > { %2465 = vmatpush1.bf16.msra.mxu1 %v4360_v44  ;;  %2506 = vmatpush1.bf16.msra.mxu0 %v4362_v45  ;;  %v685_v44 = vld [vmem:[%s5249_s26 + $0x68] sm:$0xff] }
 0x39d   : > { %2540 = vmatprep.subr.bf16.mxu1 %v4173_v46  ;;  %2581 = vmatprep.subr.bf16.mxu0 %v4175_v47  ;;  %v717_v45 = vld [vmem:[%s5249_s26 + $0x168] sm:$0xff]  ;;  %v4368_v46 = vcombine.low %v874_v34, %v906_v35  ;;  %v4370_v47 = vcombine.low %v875_v36, %v907_v37  ;;  %v4313_v34 = vcombine.high %v814_v28, %v846_v29  ;;  %v878_v36 = vld [vmem:[%s5249_s26 + $0x670] sm:$0xff] }
 0x39e   : > { %v4183_v49 = vcombine.high %v685_v44, %v717_v45  ;;  %v910_v37 = vld [vmem:[%s5249_s26 + $0x770] sm:$0xff] }
 0x39f   : > { %4418 = vmatmul.mubr.msk.bf16.vlgmr.msra.gmra.mrb[16].mxu1 %vm2208_vm5, %v5288_v19  ;;  %4419 = vmatmul.mubr.msk.bf16.vlgmr.msra.gmra.mrb[16].mxu0 %vm2208_vm5, %v5288_v19 }
 0x3a0   : > { %2541 = vmatpush1.bf16.msra.mxu1 %v4172_v52  ;;  %2582 = vmatpush1.bf16.msra.mxu0 %v4174_v53  ;;  %v749_v52 = vld [vmem:[%s5249_s26 + $0x268] sm:$0xff] }
 0x3a1   : > { %2542 = vmatprep.subr.bf16.mxu1 %v4237_v54  ;;  %2583 = vmatprep.subr.bf16.mxu0 %v4239_v55  ;;  %v781_v53 = vld [vmem:[%s5249_s26 + $0x368] sm:$0xff]  ;;  %v4180_v54 = vcombine.low %v684_v42, %v716_v43  ;;  %v4182_v55 = vcombine.low %v685_v44, %v717_v45  ;;  %v4377_v42 = vcombine.high %v878_v36, %v910_v37  ;;  %v688_v44 = vld [vmem:[%s5249_s26 + $0x80] sm:$0xff] }
 0x3a2   : > { %2572 = vmatprep.mubr.bf16.mxu1 %v4934_v10  ;;  %2613 = vmatprep.mubr.bf16.mxu0 %v4934_v10  ;;  %v4247_v57 = vcombine.high %v749_v52, %v781_v53  ;;  %v720_v45 = vld [vmem:[%s5249_s26 + $0x180] sm:$0xff] }
 0x3a4   : > { %2543 = vmatpush1.bf16.msra.mxu1 %v4236_v60  ;;  %2584 = vmatpush1.bf16.msra.mxu0 %v4238_v61  ;;  %v813_v60 = vld [vmem:[%s5249_s26 + $0x468] sm:$0xff] }
 0x3a5   : > { %2544 = vmatprep.subr.bf16.mxu1 %v4301_v62  ;;  %2585 = vmatprep.subr.bf16.mxu0 %v4303_v63  ;;  %v845_v61 = vld [vmem:[%s5249_s26 + $0x568] sm:$0xff]  ;;  %v4244_v62 = vcombine.low %v748_v50, %v780_v51  ;;  %v4246_v63 = vcombine.low %v749_v52, %v781_v53  ;;  %v4189_v50 = vcombine.high %v688_v44, %v720_v45  ;;  %v752_v52 = vld [vmem:[%s5249_s26 + $0x280] sm:$0xff] }
 0x3a6   : > { %v4311_v1 = vcombine.high %v813_v60, %v845_v61  ;;  %v784_v53 = vld [vmem:[%s5249_s26 + $0x380] sm:$0xff] }
 0x3a8   : > { %2545 = vmatpush1.bf16.msra.mxu1 %v4300_v4  ;;  %2586 = vmatpush1.bf16.msra.mxu0 %v4302_v5  ;;  %v877_v4 = vld [vmem:[%s5249_s26 + $0x668] sm:$0xff] }
 0x3a9   : > { %2546 = vmatprep.subr.bf16.mxu1 %v4365_v6  ;;  %2587 = vmatprep.subr.bf16.mxu0 %v4367_v7  ;;  %v909_v5 = vld [vmem:[%s5249_s26 + $0x768] sm:$0xff]  ;;  %v4308_v6 = vcombine.low %v812_v58, %v844_v59  ;;  %v4310_v7 = vcombine.low %v813_v60, %v845_v61  ;;  %v4253_v58 = vcombine.high %v752_v52, %v784_v53  ;;  %v816_v60 = vld [vmem:[%s5249_s26 + $0x480] sm:$0xff] }
 0x3aa   : > { %v4375_v9 = vcombine.high %v877_v4, %v909_v5  ;;  %v848_v61 = vld [vmem:[%s5249_s26 + $0x580] sm:$0xff] }
 0x3ac   : > { %2547 = vmatpush1.bf16.msra.mxu1 %v4364_v13  ;;  %2588 = vmatpush1.bf16.msra.mxu0 %v4366_v14  ;;  %v687_v13 = vld [vmem:[%s5249_s26 + $0x78] sm:$0xff] }
 0x3ad   : > { %2622 = vmatprep.subr.bf16.mxu1 %v4177_v15  ;;  %2663 = vmatprep.subr.bf16.mxu0 %v4179_v16  ;;  %v719_v14 = vld [vmem:[%s5249_s26 + $0x178] sm:$0xff]  ;;  %v4372_v15 = vcombine.low %v876_v2, %v908_v3  ;;  %v4374_v16 = vcombine.low %v877_v4, %v909_v5  ;;  %v4317_v2 = vcombine.high %v816_v60, %v848_v61  ;;  %v880_v4 = vld [vmem:[%s5249_s26 + $0x680] sm:$0xff] }
 0x3ae   : > { %v4187_v18 = vcombine.high %v687_v13, %v719_v14  ;;  %v912_v5 = vld [vmem:[%s5249_s26 + $0x780] sm:$0xff] }
 0x3af   : > { %4420 = vmatmul.mubr.msk.bf16.vlgmr.msra.gmra.mrb[20].mxu1 %vm2208_vm5, %v5288_v19  ;;  %4421 = vmatmul.mubr.msk.bf16.vlgmr.msra.gmra.mrb[20].mxu0 %vm2208_vm5, %v5288_v19 }
 0x3b0   : > { %2623 = vmatpush1.bf16.msra.mxu1 %v4176_v22  ;;  %2664 = vmatpush1.bf16.msra.mxu0 %v4178_v23  ;;  %v751_v22 = vld [vmem:[%s5249_s26 + $0x278] sm:$0xff] }
 0x3b1   : > { %2624 = vmatprep.subr.bf16.mxu1 %v4241_v24  ;;  %2665 = vmatprep.subr.bf16.mxu0 %v4243_v25  ;;  %v783_v23 = vld [vmem:[%s5249_s26 + $0x378] sm:$0xff]  ;;  %v4184_v24 = vcombine.low %v686_v11, %v718_v12  ;;  %v4186_v25 = vcombine.low %v687_v13, %v719_v14  ;;  %v4381_v11 = vcombine.high %v880_v4, %v912_v5  ;;  %v690_v13 = vld [vmem:[%s5249_s26 + $0x90] sm:$0xff] }
 0x3b2   : > { %2654 = vmatprep.mubr.bf16.mxu1 %v4934_v10  ;;  %2695 = vmatprep.mubr.bf16.mxu0 %v4934_v10  ;;  %v4251_v27 = vcombine.high %v751_v22, %v783_v23  ;;  %v722_v14 = vld [vmem:[%s5249_s26 + $0x190] sm:$0xff] }
 0x3b4   : > { %2625 = vmatpush1.bf16.msra.mxu1 %v4240_v30  ;;  %2666 = vmatpush1.bf16.msra.mxu0 %v4242_v31  ;;  %v815_v30 = vld [vmem:[%s5249_s26 + $0x478] sm:$0xff] }
 0x3b5   : > { %2626 = vmatprep.subr.bf16.mxu1 %v4305_v32  ;;  %2667 = vmatprep.subr.bf16.mxu0 %v4307_v33  ;;  %v847_v31 = vld [vmem:[%s5249_s26 + $0x578] sm:$0xff]  ;;  %v4248_v32 = vcombine.low %v750_v20, %v782_v21  ;;  %v4250_v33 = vcombine.low %v751_v22, %v783_v23  ;;  %v4193_v20 = vcombine.high %v690_v13, %v722_v14  ;;  %v754_v22 = vld [vmem:[%s5249_s26 + $0x290] sm:$0xff] }
 0x3b6   : > { %v4315_v35 = vcombine.high %v815_v30, %v847_v31  ;;  %v786_v23 = vld [vmem:[%s5249_s26 + $0x390] sm:$0xff] }
 0x3b8   : > { %2627 = vmatpush1.bf16.msra.mxu1 %v4304_v38  ;;  %2668 = vmatpush1.bf16.msra.mxu0 %v4306_v39  ;;  %v879_v38 = vld [vmem:[%s5249_s26 + $0x678] sm:$0xff] }
 0x3b9   : > { %2628 = vmatprep.subr.bf16.mxu1 %v4369_v40  ;;  %2669 = vmatprep.subr.bf16.mxu0 %v4371_v41  ;;  %v911_v39 = vld [vmem:[%s5249_s26 + $0x778] sm:$0xff]  ;;  %v4312_v40 = vcombine.low %v814_v28, %v846_v29  ;;  %v4314_v41 = vcombine.low %v815_v30, %v847_v31  ;;  %v4257_v28 = vcombine.high %v754_v22, %v786_v23  ;;  %v818_v30 = vld [vmem:[%s5249_s26 + $0x490] sm:$0xff] }
 0x3ba   : > { %v4379_v43 = vcombine.high %v879_v38, %v911_v39  ;;  %v850_v31 = vld [vmem:[%s5249_s26 + $0x590] sm:$0xff] }
 0x3bc   : > { %2629 = vmatpush1.bf16.msra.mxu1 %v4368_v46  ;;  %2670 = vmatpush1.bf16.msra.mxu0 %v4370_v47  ;;  %v689_v46 = vld [vmem:[%s5249_s26 + $0x88] sm:$0xff] }
 0x3bd   : > { %2704 = vmatprep.subr.bf16.mxu1 %v4181_v48  ;;  %2745 = vmatprep.subr.bf16.mxu0 %v4183_v49  ;;  %v721_v47 = vld [vmem:[%s5249_s26 + $0x188] sm:$0xff]  ;;  %v4376_v48 = vcombine.low %v878_v36, %v910_v37  ;;  %v4378_v49 = vcombine.low %v879_v38, %v911_v39  ;;  %v4321_v36 = vcombine.high %v818_v30, %v850_v31  ;;  %v882_v38 = vld [vmem:[%s5249_s26 + $0x690] sm:$0xff] }
 0x3be   : > { %v4191_v51 = vcombine.high %v689_v46, %v721_v47  ;;  %v914_v39 = vld [vmem:[%s5249_s26 + $0x790] sm:$0xff] }
 0x3bf   : > { %4422 = vmatmul.mubr.msk.bf16.vlgmr.msra.gmra.mrb[24].mxu1 %vm2208_vm5, %v5288_v19  ;;  %4423 = vmatmul.mubr.msk.bf16.vlgmr.msra.gmra.mrb[24].mxu0 %vm2208_vm5, %v5288_v19 }
 0x3c0   : > { %2705 = vmatpush1.bf16.msra.mxu1 %v4180_v54  ;;  %2746 = vmatpush1.bf16.msra.mxu0 %v4182_v55  ;;  %v753_v54 = vld [vmem:[%s5249_s26 + $0x288] sm:$0xff] }
 0x3c1   : > { %2706 = vmatprep.subr.bf16.mxu1 %v4245_v56  ;;  %2747 = vmatprep.subr.bf16.mxu0 %v4247_v57  ;;  %v785_v55 = vld [vmem:[%s5249_s26 + $0x388] sm:$0xff]  ;;  %v4188_v56 = vcombine.low %v688_v44, %v720_v45  ;;  %v4190_v57 = vcombine.low %v689_v46, %v721_v47  ;;  %v4385_v44 = vcombine.high %v882_v38, %v914_v39  ;;  %v692_v46 = vld [vmem:[%s5249_s26 + $0xa0] sm:$0xff] }
 0x3c2   : > { %2736 = vmatprep.mubr.bf16.mxu1 %v4934_v10  ;;  %2777 = vmatprep.mubr.bf16.mxu0 %v4934_v10  ;;  %v4255_v59 = vcombine.high %v753_v54, %v785_v55  ;;  %v724_v47 = vld [vmem:[%s5249_s26 + $0x1a0] sm:$0xff] }
 0x3c4   : > { %2707 = vmatpush1.bf16.msra.mxu1 %v4244_v62  ;;  %2748 = vmatpush1.bf16.msra.mxu0 %v4246_v63  ;;  %v817_v62 = vld [vmem:[%s5249_s26 + $0x488] sm:$0xff] }
 0x3c5   : > { %2708 = vmatprep.subr.bf16.mxu1 %v4309_v0  ;;  %2749 = vmatprep.subr.bf16.mxu0 %v4311_v1  ;;  %v849_v63 = vld [vmem:[%s5249_s26 + $0x588] sm:$0xff]  ;;  %v4252_v0 = vcombine.low %v752_v52, %v784_v53  ;;  %v4254_v1 = vcombine.low %v753_v54, %v785_v55  ;;  %v4197_v52 = vcombine.high %v692_v46, %v724_v47  ;;  %v756_v54 = vld [vmem:[%s5249_s26 + $0x2a0] sm:$0xff] }
 0x3c6   : > { %v4319_v3 = vcombine.high %v817_v62, %v849_v63  ;;  %v788_v55 = vld [vmem:[%s5249_s26 + $0x3a0] sm:$0xff] }
 0x3c8   : > { %2709 = vmatpush1.bf16.msra.mxu1 %v4308_v6  ;;  %2750 = vmatpush1.bf16.msra.mxu0 %v4310_v7  ;;  %v881_v6 = vld [vmem:[%s5249_s26 + $0x688] sm:$0xff] }
 0x3c9   : > { %2710 = vmatprep.subr.bf16.mxu1 %v4373_v8  ;;  %2751 = vmatprep.subr.bf16.mxu0 %v4375_v9  ;;  %v913_v7 = vld [vmem:[%s5249_s26 + $0x788] sm:$0xff]  ;;  %v4316_v8 = vcombine.low %v816_v60, %v848_v61  ;;  %v4318_v9 = vcombine.low %v817_v62, %v849_v63  ;;  %v4261_v60 = vcombine.high %v756_v54, %v788_v55  ;;  %v820_v62 = vld [vmem:[%s5249_s26 + $0x4a0] sm:$0xff] }
 0x3ca   : > { %v4383_v12 = vcombine.high %v881_v6, %v913_v7  ;;  %v852_v63 = vld [vmem:[%s5249_s26 + $0x5a0] sm:$0xff] }
 0x3cc   : > { %2711 = vmatpush1.bf16.msra.mxu1 %v4372_v15  ;;  %2752 = vmatpush1.bf16.msra.mxu0 %v4374_v16  ;;  %v691_v15 = vld [vmem:[%s5249_s26 + $0x98] sm:$0xff] }
 0x3cd   : > { %2786 = vmatprep.subr.bf16.mxu1 %v4185_v17  ;;  %2827 = vmatprep.subr.bf16.mxu0 %v4187_v18  ;;  %v723_v16 = vld [vmem:[%s5249_s26 + $0x198] sm:$0xff]  ;;  %v4380_v17 = vcombine.low %v880_v4, %v912_v5  ;;  %v4382_v18 = vcombine.low %v881_v6, %v913_v7  ;;  %v4325_v4 = vcombine.high %v820_v62, %v852_v63  ;;  %v884_v6 = vld [vmem:[%s5249_s26 + $0x6a0] sm:$0xff] }
 0x3ce   : > { %v4195_v21 = vcombine.high %v691_v15, %v723_v16  ;;  %v916_v7 = vld [vmem:[%s5249_s26 + $0x7a0] sm:$0xff] }
 0x3cf   : > { %4424 = vmatmul.mubr.msk.bf16.vlgmr.msra.gmra.mrb[28].mxu1 %vm2208_vm5, %v5288_v19  ;;  %4425 = vmatmul.mubr.msk.bf16.vlgmr.msra.gmra.mrb[28].mxu0 %vm2208_vm5, %v5288_v19 }
 0x3d0   : > { %2787 = vmatpush1.bf16.msra.mxu1 %v4184_v24  ;;  %2828 = vmatpush1.bf16.msra.mxu0 %v4186_v25  ;;  %v755_v24 = vld [vmem:[%s5249_s26 + $0x298] sm:$0xff] }
 0x3d1   : > { %2788 = vmatprep.subr.bf16.mxu1 %v4249_v26  ;;  %2829 = vmatprep.subr.bf16.mxu0 %v4251_v27  ;;  %v787_v25 = vld [vmem:[%s5249_s26 + $0x398] sm:$0xff]  ;;  %v4192_v26 = vcombine.low %v690_v13, %v722_v14  ;;  %v4194_v27 = vcombine.low %v691_v15, %v723_v16  ;;  %v4389_v13 = vcombine.high %v884_v6, %v916_v7  ;;  %v694_v15 = vld [vmem:[%s5249_s26 + $0xb0] sm:$0xff] }
 0x3d2   : > { %2818 = vmatprep.mubr.bf16.mxu1 %v4934_v10  ;;  %2859 = vmatprep.mubr.bf16.mxu0 %v4934_v10  ;;  %v4259_v29 = vcombine.high %v755_v24, %v787_v25  ;;  %v726_v16 = vld [vmem:[%s5249_s26 + $0x1b0] sm:$0xff] }
 0x3d4   : > { %2789 = vmatpush1.bf16.msra.mxu1 %v4248_v32  ;;  %2830 = vmatpush1.bf16.msra.mxu0 %v4250_v33  ;;  %v819_v32 = vld [vmem:[%s5249_s26 + $0x498] sm:$0xff] }
 0x3d5   : > { %2790 = vmatprep.subr.bf16.mxu1 %v4313_v34  ;;  %2831 = vmatprep.subr.bf16.mxu0 %v4315_v35  ;;  %v851_v33 = vld [vmem:[%s5249_s26 + $0x598] sm:$0xff]  ;;  %v4256_v34 = vcombine.low %v754_v22, %v786_v23  ;;  %v4258_v35 = vcombine.low %v755_v24, %v787_v25  ;;  %v4201_v22 = vcombine.high %v694_v15, %v726_v16  ;;  %v758_v24 = vld [vmem:[%s5249_s26 + $0x2b0] sm:$0xff] }
 0x3d6   : > { %v4323_v37 = vcombine.high %v819_v32, %v851_v33  ;;  %v790_v25 = vld [vmem:[%s5249_s26 + $0x3b0] sm:$0xff] }
 0x3d8   : > { %2791 = vmatpush1.bf16.msra.mxu1 %v4312_v40  ;;  %2832 = vmatpush1.bf16.msra.mxu0 %v4314_v41  ;;  %v883_v40 = vld [vmem:[%s5249_s26 + $0x698] sm:$0xff] }
 0x3d9   : > { %2792 = vmatprep.subr.bf16.mxu1 %v4377_v42  ;;  %2833 = vmatprep.subr.bf16.mxu0 %v4379_v43  ;;  %v915_v41 = vld [vmem:[%s5249_s26 + $0x798] sm:$0xff]  ;;  %v4320_v42 = vcombine.low %v818_v30, %v850_v31  ;;  %v4322_v43 = vcombine.low %v819_v32, %v851_v33  ;;  %v4265_v30 = vcombine.high %v758_v24, %v790_v25  ;;  %v822_v32 = vld [vmem:[%s5249_s26 + $0x4b0] sm:$0xff] }
 0x3da   : > { %v4387_v45 = vcombine.high %v883_v40, %v915_v41  ;;  %v854_v33 = vld [vmem:[%s5249_s26 + $0x5b0] sm:$0xff] }
 0x3dc   : > { %2793 = vmatpush1.bf16.msra.mxu1 %v4376_v48  ;;  %2834 = vmatpush1.bf16.msra.mxu0 %v4378_v49  ;;  %v693_v48 = vld [vmem:[%s5249_s26 + $0xa8] sm:$0xff] }
 0x3dd   : > { %2868 = vmatprep.subr.bf16.mxu1 %v4189_v50  ;;  %2909 = vmatprep.subr.bf16.mxu0 %v4191_v51  ;;  %v725_v49 = vld [vmem:[%s5249_s26 + $0x1a8] sm:$0xff]  ;;  %v4384_v50 = vcombine.low %v882_v38, %v914_v39  ;;  %v4386_v51 = vcombine.low %v883_v40, %v915_v41  ;;  %v4329_v38 = vcombine.high %v822_v32, %v854_v33  ;;  %v886_v40 = vld [vmem:[%s5249_s26 + $0x6b0] sm:$0xff] }
 0x3de   : > { %v4199_v53 = vcombine.high %v693_v48, %v725_v49  ;;  %v918_v41 = vld [vmem:[%s5249_s26 + $0x7b0] sm:$0xff] }
 0x3df   : > { %4426 = vmatmul.mubr.msk.bf16.vlgmr.msra.gmra.mrb[32].mxu1 %vm2208_vm5, %v5288_v19  ;;  %4427 = vmatmul.mubr.msk.bf16.vlgmr.msra.gmra.mrb[32].mxu0 %vm2208_vm5, %v5288_v19 }
 0x3e0   : > { %2869 = vmatpush1.bf16.msra.mxu1 %v4188_v56  ;;  %2910 = vmatpush1.bf16.msra.mxu0 %v4190_v57  ;;  %v757_v56 = vld [vmem:[%s5249_s26 + $0x2a8] sm:$0xff] }
 0x3e1   : > { %2870 = vmatprep.subr.bf16.mxu1 %v4253_v58  ;;  %2911 = vmatprep.subr.bf16.mxu0 %v4255_v59  ;;  %v789_v57 = vld [vmem:[%s5249_s26 + $0x3a8] sm:$0xff]  ;;  %v4196_v58 = vcombine.low %v692_v46, %v724_v47  ;;  %v4198_v59 = vcombine.low %v693_v48, %v725_v49  ;;  %v4393_v46 = vcombine.high %v886_v40, %v918_v41  ;;  %v696_v48 = vld [vmem:[%s5249_s26 + $0xc0] sm:$0xff] }
 0x3e2   : > { %2900 = vmatprep.mubr.bf16.mxu1 %v4934_v10  ;;  %2941 = vmatprep.mubr.bf16.mxu0 %v4934_v10  ;;  %v4263_v61 = vcombine.high %v757_v56, %v789_v57  ;;  %v728_v49 = vld [vmem:[%s5249_s26 + $0x1c0] sm:$0xff] }
 0x3e4   : > { %2871 = vmatpush1.bf16.msra.mxu1 %v4252_v0  ;;  %2912 = vmatpush1.bf16.msra.mxu0 %v4254_v1  ;;  %v821_v0 = vld [vmem:[%s5249_s26 + $0x4a8] sm:$0xff] }
 0x3e5   : > { %2872 = vmatprep.subr.bf16.mxu1 %v4317_v2  ;;  %2913 = vmatprep.subr.bf16.mxu0 %v4319_v3  ;;  %v853_v1 = vld [vmem:[%s5249_s26 + $0x5a8] sm:$0xff]  ;;  %v4260_v2 = vcombine.low %v756_v54, %v788_v55  ;;  %v4262_v3 = vcombine.low %v757_v56, %v789_v57  ;;  %v4205_v54 = vcombine.high %v696_v48, %v728_v49  ;;  %v760_v56 = vld [vmem:[%s5249_s26 + $0x2c0] sm:$0xff] }
 0x3e6   : > { %v4327_v5 = vcombine.high %v821_v0, %v853_v1  ;;  %v792_v57 = vld [vmem:[%s5249_s26 + $0x3c0] sm:$0xff] }
 0x3e8   : > { %2873 = vmatpush1.bf16.msra.mxu1 %v4316_v8  ;;  %2914 = vmatpush1.bf16.msra.mxu0 %v4318_v9  ;;  %v885_v8 = vld [vmem:[%s5249_s26 + $0x6a8] sm:$0xff] }
 0x3e9   : > { %2874 = vmatprep.subr.bf16.mxu1 %v4381_v11  ;;  %2915 = vmatprep.subr.bf16.mxu0 %v4383_v12  ;;  %v917_v9 = vld [vmem:[%s5249_s26 + $0x7a8] sm:$0xff]  ;;  %v4324_v11 = vcombine.low %v820_v62, %v852_v63  ;;  %v4326_v12 = vcombine.low %v821_v0, %v853_v1  ;;  %v4269_v62 = vcombine.high %v760_v56, %v792_v57  ;;  %v824_v0 = vld [vmem:[%s5249_s26 + $0x4c0] sm:$0xff] }
 0x3ea   : > { %v4391_v14 = vcombine.high %v885_v8, %v917_v9  ;;  %v856_v1 = vld [vmem:[%s5249_s26 + $0x5c0] sm:$0xff] }
 0x3ec   : > { %2875 = vmatpush1.bf16.msra.mxu1 %v4380_v17  ;;  %2916 = vmatpush1.bf16.msra.mxu0 %v4382_v18  ;;  %v695_v17 = vld [vmem:[%s5249_s26 + $0xb8] sm:$0xff] }
 0x3ed   : > { %2950 = vmatprep.subr.bf16.mxu1 %v4193_v20  ;;  %2991 = vmatprep.subr.bf16.mxu0 %v4195_v21  ;;  %v727_v18 = vld [vmem:[%s5249_s26 + $0x1b8] sm:$0xff]  ;;  %v4388_v20 = vcombine.low %v884_v6, %v916_v7  ;;  %v4390_v21 = vcombine.low %v885_v8, %v917_v9  ;;  %v4333_v6 = vcombine.high %v824_v0, %v856_v1  ;;  %v888_v8 = vld [vmem:[%s5249_s26 + $0x6c0] sm:$0xff] }
 0x3ee   : > { %v4203_v23 = vcombine.high %v695_v17, %v727_v18  ;;  %v920_v9 = vld [vmem:[%s5249_s26 + $0x7c0] sm:$0xff] }
 0x3ef   : > { %4428 = vmatmul.mubr.msk.bf16.vlgmr.msra.gmra.mrb[36].mxu1 %vm2208_vm5, %v5288_v19  ;;  %4429 = vmatmul.mubr.msk.bf16.vlgmr.msra.gmra.mrb[36].mxu0 %vm2208_vm5, %v5288_v19 }
 0x3f0   : > { %2951 = vmatpush1.bf16.msra.mxu1 %v4192_v26  ;;  %2992 = vmatpush1.bf16.msra.mxu0 %v4194_v27  ;;  %v759_v26 = vld [vmem:[%s5249_s26 + $0x2b8] sm:$0xff] }
 0x3f1   : > { %2952 = vmatprep.subr.bf16.mxu1 %v4257_v28  ;;  %2993 = vmatprep.subr.bf16.mxu0 %v4259_v29  ;;  %v791_v27 = vld [vmem:[%s5249_s26 + $0x3b8] sm:$0xff]  ;;  %v4200_v28 = vcombine.low %v694_v15, %v726_v16  ;;  %v4202_v29 = vcombine.low %v695_v17, %v727_v18  ;;  %v4397_v15 = vcombine.high %v888_v8, %v920_v9  ;;  %v698_v17 = vld [vmem:[%s5249_s26 + $0xd0] sm:$0xff] }
 0x3f2   : > { %2982 = vmatprep.mubr.bf16.mxu1 %v4934_v10  ;;  %3023 = vmatprep.mubr.bf16.mxu0 %v4934_v10  ;;  %v4267_v31 = vcombine.high %v759_v26, %v791_v27  ;;  %v730_v18 = vld [vmem:[%s5249_s26 + $0x1d0] sm:$0xff] }
 0x3f4   : > { %2953 = vmatpush1.bf16.msra.mxu1 %v4256_v34  ;;  %2994 = vmatpush1.bf16.msra.mxu0 %v4258_v35  ;;  %v823_v34 = vld [vmem:[%s5249_s26 + $0x4b8] sm:$0xff] }
 0x3f5   : > { %2954 = vmatprep.subr.bf16.mxu1 %v4321_v36  ;;  %2995 = vmatprep.subr.bf16.mxu0 %v4323_v37  ;;  %v855_v35 = vld [vmem:[%s5249_s26 + $0x5b8] sm:$0xff]  ;;  %v4264_v36 = vcombine.low %v758_v24, %v790_v25  ;;  %v4266_v37 = vcombine.low %v759_v26, %v791_v27  ;;  %v4209_v24 = vcombine.high %v698_v17, %v730_v18  ;;  %v762_v26 = vld [vmem:[%s5249_s26 + $0x2d0] sm:$0xff] }
 0x3f6   : > { %v4331_v39 = vcombine.high %v823_v34, %v855_v35  ;;  %v794_v27 = vld [vmem:[%s5249_s26 + $0x3d0] sm:$0xff] }
 0x3f8   : > { %2955 = vmatpush1.bf16.msra.mxu1 %v4320_v42  ;;  %2996 = vmatpush1.bf16.msra.mxu0 %v4322_v43  ;;  %v887_v42 = vld [vmem:[%s5249_s26 + $0x6b8] sm:$0xff] }
 0x3f9   : > { %2956 = vmatprep.subr.bf16.mxu1 %v4385_v44  ;;  %2997 = vmatprep.subr.bf16.mxu0 %v4387_v45  ;;  %v919_v43 = vld [vmem:[%s5249_s26 + $0x7b8] sm:$0xff]  ;;  %v4328_v44 = vcombine.low %v822_v32, %v854_v33  ;;  %v4330_v45 = vcombine.low %v823_v34, %v855_v35  ;;  %v4273_v32 = vcombine.high %v762_v26, %v794_v27  ;;  %v826_v34 = vld [vmem:[%s5249_s26 + $0x4d0] sm:$0xff] }
 0x3fa   : > { %v4395_v47 = vcombine.high %v887_v42, %v919_v43  ;;  %v858_v35 = vld [vmem:[%s5249_s26 + $0x5d0] sm:$0xff] }
 0x3fc   : > { %2957 = vmatpush1.bf16.msra.mxu1 %v4384_v50  ;;  %2998 = vmatpush1.bf16.msra.mxu0 %v4386_v51  ;;  %v697_v50 = vld [vmem:[%s5249_s26 + $0xc8] sm:$0xff] }
 0x3fd   : > { %3032 = vmatprep.subr.bf16.mxu1 %v4197_v52  ;;  %3073 = vmatprep.subr.bf16.mxu0 %v4199_v53  ;;  %v729_v51 = vld [vmem:[%s5249_s26 + $0x1c8] sm:$0xff]  ;;  %v4392_v52 = vcombine.low %v886_v40, %v918_v41  ;;  %v4394_v53 = vcombine.low %v887_v42, %v919_v43  ;;  %v4337_v40 = vcombine.high %v826_v34, %v858_v35  ;;  %v890_v42 = vld [vmem:[%s5249_s26 + $0x6d0] sm:$0xff] }
 0x3fe   : > { %v4207_v55 = vcombine.high %v697_v50, %v729_v51  ;;  %v922_v43 = vld [vmem:[%s5249_s26 + $0x7d0] sm:$0xff] }
 0x3ff   : > { %4430 = vmatmul.mubr.msk.bf16.vlgmr.msra.gmra.mrb[40].mxu1 %vm2208_vm5, %v5288_v19  ;;  %4431 = vmatmul.mubr.msk.bf16.vlgmr.msra.gmra.mrb[40].mxu0 %vm2208_vm5, %v5288_v19 }
 0x400   : > { %3033 = vmatpush1.bf16.msra.mxu1 %v4196_v58  ;;  %3074 = vmatpush1.bf16.msra.mxu0 %v4198_v59  ;;  %v761_v58 = vld [vmem:[%s5249_s26 + $0x2c8] sm:$0xff] }
 0x401   : > { %3034 = vmatprep.subr.bf16.mxu1 %v4261_v60  ;;  %3075 = vmatprep.subr.bf16.mxu0 %v4263_v61  ;;  %v793_v59 = vld [vmem:[%s5249_s26 + $0x3c8] sm:$0xff]  ;;  %v4204_v60 = vcombine.low %v696_v48, %v728_v49  ;;  %v4206_v61 = vcombine.low %v697_v50, %v729_v51  ;;  %v4401_v48 = vcombine.high %v890_v42, %v922_v43  ;;  %v700_v50 = vld [vmem:[%s5249_s26 + $0xe0] sm:$0xff] }
 0x402   : > { %3064 = vmatprep.mubr.bf16.mxu1 %v4934_v10  ;;  %3105 = vmatprep.mubr.bf16.mxu0 %v4934_v10  ;;  %v4271_v63 = vcombine.high %v761_v58, %v793_v59  ;;  %v732_v51 = vld [vmem:[%s5249_s26 + $0x1e0] sm:$0xff] }
 0x404   : > { %3035 = vmatpush1.bf16.msra.mxu1 %v4260_v2  ;;  %3076 = vmatpush1.bf16.msra.mxu0 %v4262_v3  ;;  %v825_v2 = vld [vmem:[%s5249_s26 + $0x4c8] sm:$0xff] }
 0x405   : > { %3036 = vmatprep.subr.bf16.mxu1 %v4325_v4  ;;  %3077 = vmatprep.subr.bf16.mxu0 %v4327_v5  ;;  %v857_v3 = vld [vmem:[%s5249_s26 + $0x5c8] sm:$0xff]  ;;  %v4268_v4 = vcombine.low %v760_v56, %v792_v57  ;;  %v4270_v5 = vcombine.low %v761_v58, %v793_v59  ;;  %v4213_v56 = vcombine.high %v700_v50, %v732_v51  ;;  %v764_v58 = vld [vmem:[%s5249_s26 + $0x2e0] sm:$0xff] }
 0x406   : > { %v4335_v7 = vcombine.high %v825_v2, %v857_v3  ;;  %v796_v59 = vld [vmem:[%s5249_s26 + $0x3e0] sm:$0xff] }
 0x408   : > { %3037 = vmatpush1.bf16.msra.mxu1 %v4324_v11  ;;  %3078 = vmatpush1.bf16.msra.mxu0 %v4326_v12  ;;  %v889_v11 = vld [vmem:[%s5249_s26 + $0x6c8] sm:$0xff] }
 0x409   : > { %3038 = vmatprep.subr.bf16.mxu1 %v4389_v13  ;;  %3079 = vmatprep.subr.bf16.mxu0 %v4391_v14  ;;  %v921_v12 = vld [vmem:[%s5249_s26 + $0x7c8] sm:$0xff]  ;;  %v4332_v13 = vcombine.low %v824_v0, %v856_v1  ;;  %v4334_v14 = vcombine.low %v825_v2, %v857_v3  ;;  %v3595_v0 = vlaneseq  ;;  %v4212_v1 = vcombine.low %v700_v50, %v732_v51  ;;  %v799_v50 = vld [vmem:[%s5249_s26 + $0x3f8] sm:$0xff] }
 0x40a   : > { %v4399_v16 = vcombine.high %v889_v11, %v921_v12  ;;  %v4277_v3 = vcombine.high %v764_v58, %v796_v59 }
 0x40c   : > { %3039 = vmatpush1.bf16.msra.mxu1 %v4388_v20  ;;  %3080 = vmatpush1.bf16.msra.mxu0 %v4390_v21  ;;  %v699_v20 = vld [vmem:[%s5249_s26 + $0xd8] sm:$0xff] }
 0x40d   : > { %3114 = vmatprep.subr.bf16.mxu1 %v4201_v22  ;;  %3155 = vmatprep.subr.bf16.mxu0 %v4203_v23  ;;  %v731_v21 = vld [vmem:[%s5249_s26 + $0x1d8] sm:$0xff]  ;;  %v4396_v22 = vcombine.low %v888_v8, %v920_v9  ;;  %v4398_v23 = vcombine.low %v889_v11, %v921_v12  ;;  %v860_v8 = vld [vmem:[%s5249_s26 + $0x5e0] sm:$0xff]  ;;  %v829_v9 = vld [vmem:[%s5249_s26 + $0x4e8] sm:$0xff]  ;;  %v4276_v12 = vcombine.low %v764_v58, %v796_v59 }
 0x40e   : > { %v4211_v25 = vcombine.high %v699_v20, %v731_v21  ;;  %v861_v11 = vld [vmem:[%s5249_s26 + $0x5e8] sm:$0xff]  ;;  %v863_v58 = vld [vmem:[%s5249_s26 + $0x5f8] sm:$0xff] }
 0x40f   : > { %4432 = vmatmul.mubr.msk.bf16.vlgmr.msra.gmra.mrb[44].mxu1 %vm2208_vm5, %v5288_v19  ;;  %4433 = vmatmul.mubr.msk.bf16.vlgmr.msra.gmra.mrb[44].mxu0 %vm2208_vm5, %v5288_v19 }
 0x410   : > { %3115 = vmatpush1.bf16.msra.mxu1 %v4200_v28  ;;  %3156 = vmatpush1.bf16.msra.mxu0 %v4202_v29  ;;  %v763_v28 = vld [vmem:[%s5249_s26 + $0x2d8] sm:$0xff] }
 0x411   : > { %3116 = vmatprep.subr.bf16.mxu1 %v4265_v30  ;;  %3157 = vmatprep.subr.bf16.mxu0 %v4267_v31  ;;  %v795_v29 = vld [vmem:[%s5249_s26 + $0x3d8] sm:$0xff]  ;;  %v4208_v30 = vcombine.low %v698_v17, %v730_v18  ;;  %v4210_v31 = vcombine.low %v699_v20, %v731_v21  ;;  %v924_v21 = vld [vmem:[%s5249_s26 + $0x7e0] sm:$0xff] }
 0x412   : > { %3146 = vmatprep.mubr.bf16.mxu1 %v4934_v10  ;;  %3187 = vmatprep.mubr.bf16.mxu0 %v4934_v10  ;;  %v4275_v33 = vcombine.high %v763_v28, %v795_v29 }
 0x414   : > { %3117 = vmatpush1.bf16.msra.mxu1 %v4264_v36  ;;  %3158 = vmatpush1.bf16.msra.mxu0 %v4266_v37  ;;  %v827_v36 = vld [vmem:[%s5249_s26 + $0x4d8] sm:$0xff] }
 0x415   : > { %3118 = vmatprep.subr.bf16.mxu1 %v4329_v38  ;;  %3159 = vmatprep.subr.bf16.mxu0 %v4331_v39  ;;  %v859_v37 = vld [vmem:[%s5249_s26 + $0x5d8] sm:$0xff]  ;;  %v4272_v38 = vcombine.low %v762_v26, %v794_v27  ;;  %v4274_v39 = vcombine.low %v763_v28, %v795_v29 }
 0x416   : > { %v4339_v41 = vcombine.high %v827_v36, %v859_v37 }
 0x418   : > { %3119 = vmatpush1.bf16.msra.mxu1 %v4328_v44  ;;  %3160 = vmatpush1.bf16.msra.mxu0 %v4330_v45  ;;  %v891_v44 = vld [vmem:[%s5249_s26 + $0x6d8] sm:$0xff] }
 0x419   : > { %3120 = vmatprep.subr.bf16.mxu1 %v4393_v46  ;;  %3161 = vmatprep.subr.bf16.mxu0 %v4395_v47  ;;  %v923_v45 = vld [vmem:[%s5249_s26 + $0x7d8] sm:$0xff]  ;;  %v4336_v46 = vcombine.low %v826_v34, %v858_v35  ;;  %v4338_v47 = vcombine.low %v827_v36, %v859_v37  ;;  %v702_v36 = vld [vmem:[%s5249_s26 + $0xf0] sm:$0xff] }
 0x41a   : > { %v4403_v49 = vcombine.high %v891_v44, %v923_v45 }
 0x41c   : > { %3121 = vmatpush1.bf16.msra.mxu1 %v4392_v52  ;;  %3162 = vmatpush1.bf16.msra.mxu0 %v4394_v53  ;;  %v701_v52 = vld [vmem:[%s5249_s26 + $0xe8] sm:$0xff] }
 0x41d   : > { %3196 = vmatprep.subr.bf16.mxu1 %v4205_v54  ;;  %3237 = vmatprep.subr.bf16.mxu0 %v4207_v55  ;;  %v733_v53 = vld [vmem:[%s5249_s26 + $0x1e8] sm:$0xff]  ;;  %v4400_v54 = vcombine.low %v890_v42, %v922_v43  ;;  %v4402_v55 = vcombine.low %v891_v44, %v923_v45 }
 0x41e   : > { %v4215_v57 = vcombine.high %v701_v52, %v733_v53  ;;  %v4214_v2 = vcombine.low %v701_v52, %v733_v53 }
 0x41f   : > { %4434 = vmatmul.mubr.msk.bf16.vlgmr.msra.gmra.mrb[48].mxu1 %vm2208_vm5, %v5288_v19  ;;  %4435 = vmatmul.mubr.msk.bf16.vlgmr.msra.gmra.mrb[48].mxu0 %vm2208_vm5, %v5288_v19 }
 0x420   : > { %3197 = vmatpush1.bf16.msra.mxu1 %v4204_v60  ;;  %3238 = vmatpush1.bf16.msra.mxu0 %v4206_v61  ;;  %v765_v60 = vld [vmem:[%s5249_s26 + $0x2e8] sm:$0xff] }
 0x421   : > { %3198 = vmatprep.subr.bf16.mxu1 %v4269_v62  ;;  %3239 = vmatprep.subr.bf16.mxu0 %v4271_v63  ;;  %v797_v61 = vld [vmem:[%s5249_s26 + $0x3e8] sm:$0xff]  ;;  %v4935_v62 = vmov 1966171168  }
 0x422   : > { %3228 = vmatprep.mubr.bf16.mxu1 %v4934_v10  ;;  %3269 = vmatprep.mubr.bf16.mxu0 %v4934_v10  ;;  %v3593_v63 = vunpack.c.l.s4 %v4935_v62 }
 0x424   : > { %3199 = vmatpush1.bf16.msra.mxu1 %v4268_v4  ;;  %3240 = vmatpush1.bf16.msra.mxu0 %v4270_v5  ;;  %v4279_v4 = vcombine.high %v765_v60, %v797_v61  ;;  %v828_v5 = vld [vmem:[%s5249_s26 + $0x4e0] sm:$0xff] }
 0x425   : > { %3200 = vmatprep.subr.bf16.mxu1 %v4333_v6  ;;  %3241 = vmatprep.subr.bf16.mxu0 %v4335_v7  ;;  %v3594_v6 = vunpack.c.0.s8 %v3593_v63  ;;  %v3596_v7 = vshrl.u32 %v3595_v0, 7  ;;  %v4340_v26 = vcombine.low %v828_v5, %v860_v8  ;;  %v894_v63 = vld [vmem:[%s5249_s26 + $0x6f0] sm:$0xff] }
 0x427   : > { %v5585_v20 = vsub.s32 %v3594_v6, %v3596_v7 }
 0x428   : > { %3201 = vmatpush1.bf16.msra.mxu1 %v4332_v13  ;;  %3242 = vmatpush1.bf16.msra.mxu0 %v4334_v14  ;;  %v4278_v13 = vcombine.low %v765_v60, %v797_v61  ;;  %v4341_v14 = vcombine.high %v828_v5, %v860_v8 }
 0x429   : > { %3202 = vmatprep.subr.bf16.mxu1 %v4397_v15  ;;  %3243 = vmatprep.subr.bf16.mxu0 %v4399_v16  ;;  %v4343_v15 = vcombine.high %v829_v9, %v861_v11  ;;  %v892_v16 = vld [vmem:[%s5249_s26 + $0x6e0] sm:$0xff] }
 0x42a   : > { %v4405_v34 = vcombine.high %v892_v16, %v924_v21  ;;  %v4404_v43 = vcombine.low %v892_v16, %v924_v21 }
 0x42c   : > { %3203 = vmatpush1.bf16.msra.mxu1 %v4396_v22  ;;  %3244 = vmatpush1.bf16.msra.mxu0 %v4398_v23  ;;  %v893_v22 = vld [vmem:[%s5249_s26 + $0x6e8] sm:$0xff] }
 0x42d   : > { %3278 = vmatprep.subr.bf16.mxu1 %v4209_v24  ;;  %3319 = vmatprep.subr.bf16.mxu0 %v4211_v25  ;;  %v925_v23 = vld [vmem:[%s5249_s26 + $0x7e8] sm:$0xff] }
 0x42e   : > { %v4407_v35 = vcombine.high %v893_v22, %v925_v23  ;;  %v4406_v44 = vcombine.low %v893_v22, %v925_v23 }
 0x42f   : > { %4436 = vmatmul.mubr.msk.bf16.vlgmr.msra.gmra.mrb[52].mxu1 %vm2208_vm5, %v5288_v19  ;;  %4437 = vmatmul.mubr.msk.bf16.vlgmr.msra.gmra.mrb[52].mxu0 %vm2208_vm5, %v5288_v19 }
 0x430   : > { %3279 = vmatpush1.bf16.msra.mxu1 %v4208_v30  ;;  %3320 = vmatpush1.bf16.msra.mxu0 %v4210_v31  ;;  %v4342_v31 = vcombine.low %v829_v9, %v861_v11 }
 0x431   : > { %3280 = vmatprep.subr.bf16.mxu1 %v4273_v32  ;;  %3321 = vmatprep.subr.bf16.mxu0 %v4275_v33 }
 0x432   : > { %3310 = vmatprep.mubr.bf16.mxu1 %v4934_v10  ;;  %3351 = vmatprep.mubr.bf16.mxu0 %v4934_v10 }
 0x434   : > { %3281 = vmatpush1.bf16.msra.mxu1 %v4272_v38  ;;  %3322 = vmatpush1.bf16.msra.mxu0 %v4274_v39  ;;  %v734_v39 = vld [vmem:[%s5249_s26 + $0x1f0] sm:$0xff] }
 0x435   : > { %3282 = vmatprep.subr.bf16.mxu1 %v4337_v40  ;;  %3323 = vmatprep.subr.bf16.mxu0 %v4339_v41  ;;  %v703_v40 = vld [vmem:[%s5249_s26 + $0xf8] sm:$0xff]  ;;  %v4217_v45 = vcombine.high %v702_v36, %v734_v39  ;;  %v4216_v51 = vcombine.low %v702_v36, %v734_v39 }
 0x436   : > { %v735_v41 = vld [vmem:[%s5249_s26 + $0x1f8] sm:$0xff] }
 0x437   : > { %v4218_v52 = vcombine.low %v703_v40, %v735_v41 }
 0x438   : > { %3283 = vmatpush1.bf16.msra.mxu1 %v4336_v46  ;;  %3324 = vmatpush1.bf16.msra.mxu0 %v4338_v47  ;;  %v4219_v46 = vcombine.high %v703_v40, %v735_v41  ;;  %v766_v47 = vld [vmem:[%s5249_s26 + $0x2f0] sm:$0xff] }
 0x439   : > { %3284 = vmatprep.subr.bf16.mxu1 %v4401_v48  ;;  %3325 = vmatprep.subr.bf16.mxu0 %v4403_v49  ;;  %v798_v48 = vld [vmem:[%s5249_s26 + $0x3f0] sm:$0xff]  ;;  %v767_v49 = vld [vmem:[%s5249_s26 + $0x2f8] sm:$0xff] }
 0x43a   : > { %v4281_v53 = vcombine.high %v766_v47, %v798_v48  ;;  %v4280_v59 = vcombine.low %v766_v47, %v798_v48  ;;  %v4282_v60 = vcombine.low %v767_v49, %v799_v50 }
 0x43c   : > { %3285 = vmatpush1.bf16.msra.mxu1 %v4400_v54  ;;  %3326 = vmatpush1.bf16.msra.mxu0 %v4402_v55  ;;  %v4283_v54 = vcombine.high %v767_v49, %v799_v50  ;;  %v830_v55 = vld [vmem:[%s5249_s26 + $0x4f0] sm:$0xff] }
 0x43d   : > { %3360 = vmatprep.subr.bf16.mxu1 %v4213_v56  ;;  %3401 = vmatprep.subr.bf16.mxu0 %v4215_v57  ;;  %v862_v56 = vld [vmem:[%s5249_s26 + $0x5f0] sm:$0xff]  ;;  %v831_v57 = vld [vmem:[%s5249_s26 + $0x4f8] sm:$0xff] }
 0x43e   : > { %v4345_v61 = vcombine.high %v830_v55, %v862_v56  ;;  %v4347_v62 = vcombine.high %v831_v57, %v863_v58  ;;  %v4344_v7 = vcombine.low %v830_v55, %v862_v56 }
 0x43f   : > { %4438 = vmatmul.mubr.msk.bf16.vlgmr.msra.gmra.mrb[56].mxu1 %vm2208_vm5, %v5288_v19  ;;  %4439 = vmatmul.mubr.msk.bf16.vlgmr.msra.gmra.mrb[56].mxu0 %vm2208_vm5, %v5288_v19 }
 0x440   : > { %3361 = vmatpush1.bf16.msra.mxu1 %v4212_v1  ;;  %3402 = vmatpush1.bf16.msra.mxu0 %v4214_v2  ;;  %v926_v2 = vld [vmem:[%s5249_s26 + $0x7f0] sm:$0xff] }
 0x441   : > { %3362 = vmatprep.subr.bf16.mxu1 %v4277_v3  ;;  %3403 = vmatprep.subr.bf16.mxu0 %v4279_v4  ;;  %v895_v3 = vld [vmem:[%s5249_s26 + $0x6f8] sm:$0xff]  ;;  %v4409_v16 = vcombine.high %v894_v63, %v926_v2  ;;  %v4408_v22 = vcombine.low %v894_v63, %v926_v2 }
 0x442   : > { %v2246_v17 = vpop.f32.mrb[4].mxu1  ;;  %v2287_v18 = vpop.f32.mrb[4].mxu0  ;;  %3392 = vmatprep.mubr.bf16.mxu1 %v4934_v10  ;;  %3433 = vmatprep.mubr.bf16.mxu0 %v4934_v10  ;;  %v927_v4 = vld [vmem:[%s5249_s26 + $0x7f8] sm:$0xff] }
 0x443   : > { %v2248_v24 = vpop.f32.mrb[5].mxu1  ;;  %v2289_v25 = vpop.f32.mrb[5].mxu0  ;;  %v4410_v23 = vcombine.low %v895_v3, %v927_v4 }
 0x444   : > { %v3588_v27 = vcombine.low %v2246_v17, %v2248_v24  ;;  %v3589_v28 = vcombine.low %v2287_v18, %v2289_v25  ;;  %3363 = vmatpush1.bf16.msra.mxu1 %v4276_v12  ;;  %3404 = vmatpush1.bf16.msra.mxu0 %v4278_v13  ;;  %v2250_v29 = vpop.f32.mrb[6].mxu1  ;;  %v2291_v30 = vpop.f32.mrb[6].mxu0  ;;  %v4346_v13 = vcombine.low %v831_v57, %v863_v58 }
 0x445   : > { %v2251_v32 = vpop.f32.mrb[7].mxu1  ;;  %v2292_v33 = vpop.f32.mrb[7].mxu0  ;;  %3364 = vmatprep.subr.bf16.mxu1 %v4341_v14  ;;  %3405 = vmatprep.subr.bf16.mxu0 %v4343_v15  ;;  %v4411_v17 = vcombine.high %v895_v3, %v927_v4 }
 0x446   : > { %v5594_v37 = vrot.slane %v3588_v27, %v5585_v20  ;;  %v5597_v38 = vrot.slane %v3589_v28, %v5585_v20 }
 0x448   : > { %v3620_v42 = vcombine.low %v5594_v37, %v5597_v38  ;;  %3365 = vmatpush1.bf16.msra.mxu1 %v4340_v26  ;;  %3406 = vmatpush1.bf16.msra.mxu0 %v4342_v31 }
 0x449   : > { %3366 = vmatprep.subr.bf16.mxu1 %v4405_v34  ;;  %3407 = vmatprep.subr.bf16.mxu0 %v4407_v35 }
 0x44a   : > { %v3628_v24 = vrot.slane %v3620_v42, %v5585_v20 }
 0x44c   : > { %3367 = vmatpush1.bf16.msra.mxu1 %v4404_v43  ;;  %3408 = vmatpush1.bf16.msra.mxu0 %v4406_v44 }
 0x44d   : > { %3442 = vmatprep.subr.bf16.mxu1 %v4217_v45  ;;  %3483 = vmatprep.subr.bf16.mxu0 %v4219_v46 }
 0x44f   : > { %4440 = vmatmul.mubr.msk.bf16.vlgmr.msra.gmra.mrb[60].mxu1 %vm2208_vm5, %v5288_v19  ;;  %4441 = vmatmul.mubr.msk.bf16.vlgmr.msra.gmra.mrb[60].mxu0 %vm2208_vm5, %v5288_v19 }
 0x450   : > { %3443 = vmatpush1.bf16.msra.mxu1 %v4216_v51  ;;  %3484 = vmatpush1.bf16.msra.mxu0 %v4218_v52 }
 0x451   : > { %3444 = vmatprep.subr.bf16.mxu1 %v4281_v53  ;;  %3485 = vmatprep.subr.bf16.mxu0 %v4283_v54 }
 0x452   : > { %v2328_v0 = vpop.f32.mrb[8].mxu1  ;;  %v2369_v1 = vpop.f32.mrb[8].mxu0  ;;  %3474 = vmatprep.mubr.bf16.mxu1 %v4934_v10  ;;  %3515 = vmatprep.mubr.bf16.mxu0 %v4934_v10 }
 0x453   : > { %v2330_v5 = vpop.f32.mrb[9].mxu1  ;;  %v2371_v6 = vpop.f32.mrb[9].mxu0 }
 0x454   : > { %v3590_v8 = vcombine.low %v2328_v0, %v2330_v5  ;;  %v3591_v9 = vcombine.low %v2369_v1, %v2371_v6  ;;  %v2332_v11 = vpop.f32.mrb[10].mxu1  ;;  %v2373_v12 = vpop.f32.mrb[10].mxu0  ;;  %3445 = vmatpush1.bf16.msra.mxu1 %v4280_v59  ;;  %3486 = vmatpush1.bf16.msra.mxu0 %v4282_v60 }
 0x455   : > { %v2333_v14 = vpop.f32.mrb[11].mxu1  ;;  %v2374_v15 = vpop.f32.mrb[11].mxu0  ;;  %3446 = vmatprep.subr.bf16.mxu1 %v4345_v61  ;;  %3487 = vmatprep.subr.bf16.mxu0 %v4347_v62 }
 0x456   : > { %v3612_v10 = vrot.slane %v3590_v8, %v5585_v20  ;;  %v3619_v18 = vrot.slane %v3591_v9, %v5585_v20 }
 0x458   : > { %v3621_v21 = vcombine.low %v3612_v10, %v3619_v18  ;;  %3447 = vmatpush1.bf16.msra.mxu1 %v4344_v7  ;;  %3488 = vmatpush1.bf16.msra.mxu0 %v4346_v13 }
 0x459   : > { %3448 = vmatprep.subr.bf16.mxu1 %v4409_v16  ;;  %3489 = vmatprep.subr.bf16.mxu0 %v4411_v17 }
 0x45a   : > { %v3635_v25 = vrot.slane %v3621_v21, %v5585_v20 }
 0x45c   : > { %v3636_v26 = vcombine.low %v3628_v24, %v3635_v25  ;;  %3449 = vmatpush1.bf16.msra.mxu1 %v4408_v22  ;;  %3490 = vmatpush1.bf16.msra.mxu0 %v4410_v23 }
 0x45e   : > { %3988 = vst [vmem:[%s5640_s15] sm:$0xff] %v3636_v26 }
 0x45f   : > { %4442 = vmatmul.mubr.msk.bf16.vlgmr.msra.gmra.mrb[64].mxu1 %vm2208_vm5, %v5288_v19  ;;  %4443 = vmatmul.mubr.msk.bf16.vlgmr.msra.gmra.mrb[64].mxu0 %vm2208_vm5, %v5288_v19 }
 0x462   : > { %v2410_v27 = vpop.f32.mrb[12].mxu1  ;;  %v2451_v28 = vpop.f32.mrb[12].mxu0 }
 0x463   : > { %v2412_v29 = vpop.f32.mrb[13].mxu1  ;;  %v2453_v30 = vpop.f32.mrb[13].mxu0 }
 0x464   : > { %v3637_v31 = vcombine.low %v2410_v27, %v2412_v29  ;;  %v3638_v32 = vcombine.low %v2451_v28, %v2453_v30  ;;  %v2414_v33 = vpop.f32.mrb[14].mxu1  ;;  %v2455_v34 = vpop.f32.mrb[14].mxu0 }
 0x465   : > { %v2415_v35 = vpop.f32.mrb[15].mxu1  ;;  %v2456_v36 = vpop.f32.mrb[15].mxu0 }
 0x466   : > { %v3647_v37 = vrot.slane %v3637_v31, %v5585_v20  ;;  %v3654_v38 = vrot.slane %v3638_v32, %v5585_v20 }
 0x468   : > { %v3669_v39 = vcombine.low %v3647_v37, %v3654_v38 }
 0x46a   : > { %v3677_v52 = vrot.slane %v3669_v39, %v5585_v20 }
 0x472   : > { %v2492_v40 = vpop.f32.mrb[16].mxu1  ;;  %v2533_v41 = vpop.f32.mrb[16].mxu0 }
 0x473   : > { %v2494_v42 = vpop.f32.mrb[17].mxu1  ;;  %v2535_v19 = vpop.f32.mrb[17].mxu0 }
 0x474   : > { %v3639_v43 = vcombine.low %v2492_v40, %v2494_v42  ;;  %v3640_v44 = vcombine.low %v2533_v41, %v2535_v19  ;;  %v2496_v45 = vpop.f32.mrb[18].mxu1  ;;  %v2537_v46 = vpop.f32.mrb[18].mxu0 }
 0x475   : > { %v2497_v47 = vpop.f32.mrb[19].mxu1  ;;  %v2538_v48 = vpop.f32.mrb[19].mxu0 }
 0x476   : > { %v3661_v49 = vrot.slane %v3639_v43, %v5585_v20  ;;  %v3668_v50 = vrot.slane %v3640_v44, %v5585_v20 }
 0x478   : > { %v3670_v51 = vcombine.low %v3661_v49, %v3668_v50 }
 0x47a   : > { %v3684_v53 = vrot.slane %v3670_v51, %v5585_v20 }
 0x47c   : > { %v3685_v54 = vcombine.low %v3677_v52, %v3684_v53 }
 0x47e   : > { %3989 = vst [vmem:[%s5640_s15 + $0x8] sm:$0xff] %v3685_v54 }
 0x482   : > { %v2574_v55 = vpop.f32.mrb[20].mxu1  ;;  %v2615_v56 = vpop.f32.mrb[20].mxu0 }
 0x483   : > { %v2576_v57 = vpop.f32.mrb[21].mxu1  ;;  %v2617_v58 = vpop.f32.mrb[21].mxu0 }
 0x484   : > { %v3686_v59 = vcombine.low %v2574_v55, %v2576_v57  ;;  %v3687_v60 = vcombine.low %v2615_v56, %v2617_v58  ;;  %v2578_v61 = vpop.f32.mrb[22].mxu1  ;;  %v2619_v62 = vpop.f32.mrb[22].mxu0 }
 0x485   : > { %v2579_v63 = vpop.f32.mrb[23].mxu1  ;;  %v2620_v0 = vpop.f32.mrb[23].mxu0 }
 0x486   : > { %v3696_v1 = vrot.slane %v3686_v59, %v5585_v20  ;;  %v3703_v2 = vrot.slane %v3687_v60, %v5585_v20 }
 0x488   : > { %v3718_v3 = vcombine.low %v3696_v1, %v3703_v2 }
 0x48a   : > { %v3726_v10 = vrot.slane %v3718_v3, %v5585_v20 }
 0x492   : > { %v2656_v4 = vpop.f32.mrb[24].mxu1  ;;  %v2697_v5 = vpop.f32.mrb[24].mxu0 }
 0x493   : > { %v2658_v6 = vpop.f32.mrb[25].mxu1  ;;  %v2699_v7 = vpop.f32.mrb[25].mxu0 }
 0x494   : > { %v3688_v8 = vcombine.low %v2656_v4, %v2658_v6  ;;  %v3689_v9 = vcombine.low %v2697_v5, %v2699_v7  ;;  %v2660_v11 = vpop.f32.mrb[26].mxu1  ;;  %v2701_v12 = vpop.f32.mrb[26].mxu0 }
 0x495   : > { %v2661_v13 = vpop.f32.mrb[27].mxu1  ;;  %v2702_v14 = vpop.f32.mrb[27].mxu0 }
 0x496   : > { %v3710_v15 = vrot.slane %v3688_v8, %v5585_v20  ;;  %v3717_v16 = vrot.slane %v3689_v9, %v5585_v20 }
 0x498   : > { %v3719_v17 = vcombine.low %v3710_v15, %v3717_v16 }
 0x49a   : > { %v3733_v18 = vrot.slane %v3719_v17, %v5585_v20 }
 0x49c   : > { %v3734_v21 = vcombine.low %v3726_v10, %v3733_v18 }
 0x49e   : > { %3990 = vst [vmem:[%s5640_s15 + $0x10] sm:$0xff] %v3734_v21 }
 0x4a2   : > { %v2738_v22 = vpop.f32.mrb[28].mxu1  ;;  %v2779_v23 = vpop.f32.mrb[28].mxu0 }
 0x4a3   : > { %v2740_v24 = vpop.f32.mrb[29].mxu1  ;;  %v2781_v25 = vpop.f32.mrb[29].mxu0 }
 0x4a4   : > { %v3735_v26 = vcombine.low %v2738_v22, %v2740_v24  ;;  %v3736_v27 = vcombine.low %v2779_v23, %v2781_v25  ;;  %v2742_v28 = vpop.f32.mrb[30].mxu1  ;;  %v2783_v29 = vpop.f32.mrb[30].mxu0 }
 0x4a5   : > { %v2743_v30 = vpop.f32.mrb[31].mxu1  ;;  %v2784_v31 = vpop.f32.mrb[31].mxu0 }
 0x4a6   : > { %v3745_v32 = vrot.slane %v3735_v26, %v5585_v20  ;;  %v3752_v33 = vrot.slane %v3736_v27, %v5585_v20 }
 0x4a8   : > { %v3767_v34 = vcombine.low %v3745_v32, %v3752_v33 }
 0x4aa   : > { %v3775_v47 = vrot.slane %v3767_v34, %v5585_v20 }
 0x4b2   : > { %v2820_v35 = vpop.f32.mrb[32].mxu1  ;;  %v2861_v36 = vpop.f32.mrb[32].mxu0 }
 0x4b3   : > { %v2822_v37 = vpop.f32.mrb[33].mxu1  ;;  %v2863_v38 = vpop.f32.mrb[33].mxu0 }
 0x4b4   : > { %v3737_v39 = vcombine.low %v2820_v35, %v2822_v37  ;;  %v3738_v40 = vcombine.low %v2861_v36, %v2863_v38  ;;  %v2824_v41 = vpop.f32.mrb[34].mxu1  ;;  %v2865_v42 = vpop.f32.mrb[34].mxu0 }
 0x4b5   : > { %v2825_v19 = vpop.f32.mrb[35].mxu1  ;;  %v2866_v43 = vpop.f32.mrb[35].mxu0 }
 0x4b6   : > { %v3759_v44 = vrot.slane %v3737_v39, %v5585_v20  ;;  %v3766_v45 = vrot.slane %v3738_v40, %v5585_v20 }
 0x4b8   : > { %v3768_v46 = vcombine.low %v3759_v44, %v3766_v45 }
 0x4ba   : > { %v3782_v48 = vrot.slane %v3768_v46, %v5585_v20 }
 0x4bc   : > { %v3783_v49 = vcombine.low %v3775_v47, %v3782_v48 }
 0x4be   : > { %3991 = vst [vmem:[%s5640_s15 + $0x18] sm:$0xff] %v3783_v49 }
 0x4c2   : > { %v2902_v50 = vpop.f32.mrb[36].mxu1  ;;  %v2943_v51 = vpop.f32.mrb[36].mxu0 }
 0x4c3   : > { %v2904_v52 = vpop.f32.mrb[37].mxu1  ;;  %v2945_v53 = vpop.f32.mrb[37].mxu0 }
 0x4c4   : > { %v3784_v54 = vcombine.low %v2902_v50, %v2904_v52  ;;  %v3785_v55 = vcombine.low %v2943_v51, %v2945_v53  ;;  %v2906_v56 = vpop.f32.mrb[38].mxu1  ;;  %v2947_v57 = vpop.f32.mrb[38].mxu0 }
 0x4c5   : > { %v2907_v58 = vpop.f32.mrb[39].mxu1  ;;  %v2948_v59 = vpop.f32.mrb[39].mxu0 }
 0x4c6   : > { %v3794_v60 = vrot.slane %v3784_v54, %v5585_v20  ;;  %v3801_v61 = vrot.slane %v3785_v55, %v5585_v20 }
 0x4c8   : > { %v3816_v62 = vcombine.low %v3794_v60, %v3801_v61 }
 0x4ca   : > { %v3824_v13 = vrot.slane %v3816_v62, %v5585_v20 }
 0x4d2   : > { %v2984_v63 = vpop.f32.mrb[40].mxu1  ;;  %v3025_v0 = vpop.f32.mrb[40].mxu0 }
 0x4d3   : > { %v2986_v1 = vpop.f32.mrb[41].mxu1  ;;  %v3027_v2 = vpop.f32.mrb[41].mxu0 }
 0x4d4   : > { %v3786_v3 = vcombine.low %v2984_v63, %v2986_v1  ;;  %v3787_v4 = vcombine.low %v3025_v0, %v3027_v2  ;;  %v2988_v5 = vpop.f32.mrb[42].mxu1  ;;  %v3029_v6 = vpop.f32.mrb[42].mxu0 }
 0x4d5   : > { %v2989_v7 = vpop.f32.mrb[43].mxu1  ;;  %v3030_v8 = vpop.f32.mrb[43].mxu0 }
 0x4d6   : > { %v3808_v9 = vrot.slane %v3786_v3, %v5585_v20  ;;  %v3815_v11 = vrot.slane %v3787_v4, %v5585_v20 }
 0x4d8   : > { %v3817_v12 = vcombine.low %v3808_v9, %v3815_v11 }
 0x4da   : > { %v3831_v14 = vrot.slane %v3817_v12, %v5585_v20 }
 0x4dc   : > { %v3832_v15 = vcombine.low %v3824_v13, %v3831_v14 }
 0x4de   : > { %3992 = vst [vmem:[%s5640_s15 + $0x20] sm:$0xff] %v3832_v15 }
 0x4e2   : > { %v3066_v16 = vpop.f32.mrb[44].mxu1  ;;  %v3107_v17 = vpop.f32.mrb[44].mxu0 }
 0x4e3   : > { %v3068_v10 = vpop.f32.mrb[45].mxu1  ;;  %v3109_v18 = vpop.f32.mrb[45].mxu0 }
 0x4e4   : > { %v3833_v21 = vcombine.low %v3066_v16, %v3068_v10  ;;  %v3834_v22 = vcombine.low %v3107_v17, %v3109_v18  ;;  %v3070_v23 = vpop.f32.mrb[46].mxu1  ;;  %v3111_v24 = vpop.f32.mrb[46].mxu0 }
 0x4e5   : > { %v3071_v25 = vpop.f32.mrb[47].mxu1  ;;  %v3112_v26 = vpop.f32.mrb[47].mxu0 }
 0x4e6   : > { %v3843_v27 = vrot.slane %v3833_v21, %v5585_v20  ;;  %v3850_v28 = vrot.slane %v3834_v22, %v5585_v20 }
 0x4e8   : > { %v3865_v29 = vcombine.low %v3843_v27, %v3850_v28 }
 0x4ea   : > { %v3873_v19 = vrot.slane %v3865_v29, %v5585_v20 }
 0x4f2   : > { %v3148_v30 = vpop.f32.mrb[48].mxu1  ;;  %v3189_v31 = vpop.f32.mrb[48].mxu0 }
 0x4f3   : > { %v3150_v32 = vpop.f32.mrb[49].mxu1  ;;  %v3191_v33 = vpop.f32.mrb[49].mxu0 }
 0x4f4   : > { %v3835_v34 = vcombine.low %v3148_v30, %v3150_v32  ;;  %v3836_v35 = vcombine.low %v3189_v31, %v3191_v33  ;;  %v3152_v36 = vpop.f32.mrb[50].mxu1  ;;  %v3193_v37 = vpop.f32.mrb[50].mxu0 }
 0x4f5   : > { %v3153_v38 = vpop.f32.mrb[51].mxu1  ;;  %v3194_v39 = vpop.f32.mrb[51].mxu0 }
 0x4f6   : > { %v3857_v40 = vrot.slane %v3835_v34, %v5585_v20  ;;  %v3864_v41 = vrot.slane %v3836_v35, %v5585_v20 }
 0x4f8   : > { %v3866_v42 = vcombine.low %v3857_v40, %v3864_v41 }
 0x4fa   : > { %v3880_v43 = vrot.slane %v3866_v42, %v5585_v20 }
 0x4fc   : > { %v3881_v44 = vcombine.low %v3873_v19, %v3880_v43 }
 0x4fe   : > { %3993 = vst [vmem:[%s5640_s15 + $0x28] sm:$0xff] %v3881_v44 }
 0x502   : > { %v3230_v45 = vpop.f32.mrb[52].mxu1  ;;  %v3271_v46 = vpop.f32.mrb[52].mxu0 }
 0x503   : > { %v3232_v47 = vpop.f32.mrb[53].mxu1  ;;  %v3273_v48 = vpop.f32.mrb[53].mxu0 }
 0x504   : > { %v3882_v49 = vcombine.low %v3230_v45, %v3232_v47  ;;  %v3883_v50 = vcombine.low %v3271_v46, %v3273_v48  ;;  %v3234_v51 = vpop.f32.mrb[54].mxu1  ;;  %v3275_v52 = vpop.f32.mrb[54].mxu0 }
 0x505   : > { %v3235_v53 = vpop.f32.mrb[55].mxu1  ;;  %v3276_v54 = vpop.f32.mrb[55].mxu0 }
 0x506   : > { %v3892_v55 = vrot.slane %v3882_v49, %v5585_v20  ;;  %v3899_v56 = vrot.slane %v3883_v50, %v5585_v20 }
 0x508   : > { %v3914_v57 = vcombine.low %v3892_v55, %v3899_v56 }
 0x50a   : > { %v3922_v7 = vrot.slane %v3914_v57, %v5585_v20 }
 0x512   : > { %v3312_v58 = vpop.f32.mrb[56].mxu1  ;;  %v3353_v59 = vpop.f32.mrb[56].mxu0 }
 0x513   : > { %v3314_v60 = vpop.f32.mrb[57].mxu1  ;;  %v3355_v61 = vpop.f32.mrb[57].mxu0 }
 0x514   : > { %v3884_v62 = vcombine.low %v3312_v58, %v3314_v60  ;;  %v3885_v63 = vcombine.low %v3353_v59, %v3355_v61  ;;  %v3316_v0 = vpop.f32.mrb[58].mxu1  ;;  %v3357_v1 = vpop.f32.mrb[58].mxu0 }
 0x515   : > { %v3317_v2 = vpop.f32.mrb[59].mxu1  ;;  %v3358_v3 = vpop.f32.mrb[59].mxu0 }
 0x516   : > { %v3906_v4 = vrot.slane %v3884_v62, %v5585_v20  ;;  %v3913_v5 = vrot.slane %v3885_v63, %v5585_v20 }
 0x518   : > { %v3915_v6 = vcombine.low %v3906_v4, %v3913_v5 }
 0x51a   : > { %v3929_v8 = vrot.slane %v3915_v6, %v5585_v20 }
 0x51c   : > { %v3930_v9 = vcombine.low %v3922_v7, %v3929_v8 }
 0x51e   : > { %3994 = vst [vmem:[%s5640_s15 + $0x30] sm:$0xff] %v3930_v9 }
 0x522   : > { %v3394_v11 = vpop.f32.mrb[60].mxu1  ;;  %v3435_v12 = vpop.f32.mrb[60].mxu0 }
 0x523   : > { %v3396_v13 = vpop.f32.mrb[61].mxu1  ;;  %v3437_v14 = vpop.f32.mrb[61].mxu0 }
 0x524   : > { %v3931_v15 = vcombine.low %v3394_v11, %v3396_v13  ;;  %v3932_v16 = vcombine.low %v3435_v12, %v3437_v14  ;;  %v3398_v17 = vpop.f32.mrb[62].mxu1  ;;  %v3439_v10 = vpop.f32.mrb[62].mxu0 }
 0x525   : > { %v3399_v18 = vpop.f32.mrb[63].mxu1  ;;  %v3440_v21 = vpop.f32.mrb[63].mxu0 }
 0x526   : > { %v3941_v22 = vrot.slane %v3931_v15, %v5585_v20  ;;  %v3948_v23 = vrot.slane %v3932_v16, %v5585_v20 }
 0x528   : > { %v3963_v24 = vcombine.low %v3941_v22, %v3948_v23 }
 0x52a   : > { %v3971_v38 = vrot.slane %v3963_v24, %v5585_v20 }
 0x532   : > { %v3476_v25 = vpop.f32.mrb[64].mxu1  ;;  %v3517_v26 = vpop.f32.mrb[64].mxu0 }
 0x533   : > { %v3478_v27 = vpop.f32.mrb[65].mxu1  ;;  %v3519_v28 = vpop.f32.mrb[65].mxu0 }
 0x534   : > { %v3933_v29 = vcombine.low %v3476_v25, %v3478_v27  ;;  %v3934_v30 = vcombine.low %v3517_v26, %v3519_v28  ;;  %v3480_v31 = vpop.f32.mrb[66].mxu1  ;;  %v3521_v32 = vpop.f32.mrb[66].mxu0 }
 0x535   : > { %v3481_v33 = vpop.f32.mrb[67].mxu1  ;;  %v3522_v34 = vpop.f32.mrb[67].mxu0 }
 0x536   : > { %v3955_v35 = vrot.slane %v3933_v29, %v5585_v20  ;;  %v3962_v36 = vrot.slane %v3934_v30, %v5585_v20 }
 0x538   : > { %v3964_v37 = vcombine.low %v3955_v35, %v3962_v36 }
 0x53a   : > { %v3978_v39 = vrot.slane %v3964_v37, %v5585_v20 }
 0x53c   : > { %v3979_v40 = vcombine.low %v3971_v38, %v3978_v39 }
 0x53e   : > { %3995 = vst [vmem:[%s5640_s15 + $0x38] sm:$0xff] %v3979_v40 }
 0x53f PF: > { %p22_p5 = scmp.ge.s32.totalorder %s5169_s24, 19   ;;  %s5734_s27 = smov %s4909_s28 }
 0x540   : > { %s5735_s28 = smov %s4913_s29  ;;  %s5736_s29 = smov %s5180_s17 }
 0x541   : > { %s5737_s30 = smov %s5169_s24  ;;  %24 = sbr.rel (!%p22_p5) target bundleno = 9 (0x9), region = 121 }
 0x548   :  { %4016 = vsyncpa [#allocation3], 1 }
 0x549   :  { %4018 = vsyncpa [#allocation3 + $0x1], 1 }
 0x54a   :  { %4019 = vsyncpa [#allocation5], 1 }
 0x54b   :  { %4020 = vsyncpa [#allocation8], 1 }
 0x54c   :  { %4021 = vsyncpa [#allocation11], 1 }
 0x54d   :  { %4022 = vsyncpa [#allocation14], 1 }
 0x54e   :  { %4024 = vsyncpa [#allocation14 + $0x1], 1 }

</bundles_post_ra>
